<compile_context>
chip_gen: v5e
topology: v5e:2x2
jax: 0.10.0
libtpu: 0.0.40
codegen_flags: <defaults>
</compile_context>

<pallas_src>
import functools

import jax
import jax.numpy as jnp
from jax import lax
from jax.experimental import pallas as pl
from jax.experimental.pallas import tpu as pltpu


def _round_up(v: int, m: int) -> int:
    return (v + m - 1) // m * m


def _kmeans_kernel(p0_ref, x_ref, proto_ref, idx_ref,
                   p_scr, pn_scr, half_pnsq_scr, sums_scr, counts_scr, done_ref,
                   *, n_clusters: int, n_valid: int, update_in_bf16: bool):
    it = pl.program_id(0)                 # k-means iteration
    c = pl.program_id(1)                  # N-chunk within the iteration
    last_chunk = pl.num_programs(1) - 1
    C, D = x_ref.shape
    KP = p_scr.shape[0]                   # n_clusters padded to a multiple of 128
    K = n_clusters

    # ---- one-time init: prototypes = x[:K] (pre-padded to KP rows) ----
    @pl.when((it == 0) & (c == 0))
    def _init():
        p_scr[...] = p0_ref[...]
        done_ref[0] = 0

    # ---- everything below is skipped once converged (early stop) ----
    @pl.when(done_ref[0] == 0)
    def _active():

        # -- per-iteration prologue (chunk 0): normalize prototypes once --
        @pl.when(c == 0)
        def _prologue():
            p = p_scr[...]                                            # (KP,D) f32
            inv_pnorm = lax.rsqrt(jnp.maximum(
                jnp.sum(p * p, axis=-1, keepdims=True), 1e-24))       # (KP,1)
            pn = p * inv_pnorm                    # == p / max(||p||, 1e-12)
            pn_scr[...] = pn.astype(jnp.bfloat16)
            # ||pn_k||^2 as a lane-oriented (1,KP) row via a tiny NT matmul
            # (avoids a (KP,1)->(1,KP) relayout).  Fake (padded) clusters get
            # +1e30 so score = sim - 0.5*||pn||^2 can never be maximal there.
            pnsq_row = lax.dot_general(
                jnp.ones((1, D), jnp.float32), pn * pn,
                (((1,), (1,)), ((), ())),
                preferred_element_type=jnp.float32)                   # (1,KP)
            lane = lax.broadcasted_iota(jnp.int32, (1, KP), 1)
            half_pnsq_scr[...] = jnp.where(lane < K, 0.5 * pnsq_row,
                                           jnp.float32(1e30))
            sums_scr[...] = jnp.zeros_like(sums_scr)
            counts_scr[...] = jnp.zeros_like(counts_scr)

        # -- assignment for this chunk (bf16 MXU matmul, NT form, no sqrt) --
        xc = x_ref[...]                                               # (C,D) f32
        inv_xnorm = lax.rsqrt(jnp.maximum(
            jnp.sum(xc * xc, axis=-1, keepdims=True), 1e-24))         # (C,1)
        xn = (xc * inv_xnorm).astype(jnp.bfloat16)                    # (C,D) bf16
        sim = lax.dot_general(xn, pn_scr[...],
                              (((1,), (1,)), ((), ())),
                              preferred_element_type=jnp.float32)     # (C,KP) f32
        # argmin ||xn_i - pn_k||  ==  argmax_k (sim - 0.5*||pn_k||^2)
        score = sim - half_pnsq_scr[...]
        best = jnp.max(score, axis=-1, keepdims=True)                 # (C,1)
        col = lax.broadcasted_iota(jnp.int32, (C, KP), 1)
        idx = jnp.min(jnp.where(score == best, col, KP),
                      axis=-1, keepdims=True)                         # (C,1) i32
        off = pl.multiple_of(c * C, C)
        idx_ref[pl.ds(off, C), :] = idx    # VMEM-resident output; one HBM store

        # -- partial center update: one_hot^T @ x and per-cluster counts --
        mm_dtype = jnp.bfloat16 if update_in_bf16 else jnp.float32
        one_hot = (col == idx).astype(mm_dtype)                       # (C,KP)
        row = lax.broadcasted_iota(jnp.int32, (C, 1), 0)
        valid = ((off + row) < n_valid).astype(mm_dtype)              # (C,1)
        sums_scr[...] += lax.dot_general(
            one_hot, xc.astype(mm_dtype),
            (((0,), (0,)), ((), ())),
            preferred_element_type=jnp.float32)                       # (KP,D)
        counts_scr[...] += lax.dot_general(
            one_hot, valid,
            (((0,), (0,)), ((), ())),
            preferred_element_type=jnp.float32)                       # (KP,1)

        # -- per-iteration epilogue (last chunk): new centers + early stop --
        @pl.when(c == last_chunk)
        def _epilogue():
            p_old = p_scr[...]
            recip = pl.reciprocal(counts_scr[...] + 1e-6, approx=True)
            p_new = sums_scr[...] * recip                             # (KP,D)
            diff = p_new - p_old
            # fake rows are 0 in both -> sum == sum over the real K rows
            variation = jnp.sum(diff * diff) * (1.0 / float(K * D))
            p_scr[...] = p_new
            proto_ref[...] = p_new[0:K, :]

            @pl.when(variation < 1e-5)
            def _():
                done_ref[0] = 1


def kmeans_unitspace(x, n_clusters: int = 20, max_iter: int = 100, *,
                     chunk_rows: int = 512, update_in_bf16: bool = False):
    """Pallas TPU implementation of KmeansUnitspace.forward.

    Returns (prototypes [K, D] f32, nearest_idx [N] i32).
    """
    x = jnp.asarray(x, jnp.float32)
    N, D = x.shape
    K = int(n_clusters)
    assert N >= K, "need at least n_clusters samples"

    KP = _round_up(max(K, 128), 128)      # pad clusters to full 128-lane tiles
    C = min(_round_up(N, 8), max(8, _round_up(chunk_rows, 8)))   # rows per chunk
    Np = _round_up(N, C)
    n_chunks = Np // C

    x_pad = x if Np == N else jnp.pad(x, ((0, Np - N), (0, 0)))
    # initial (padded) prototypes = x[:K]; fake rows stay exactly zero
    p0 = jnp.zeros((KP, D), jnp.float32).at[:K, :].set(x[:K, :])

    kernel = functools.partial(_kmeans_kernel, n_clusters=K, n_valid=N,
                               update_in_bf16=update_in_bf16)

    cost = pl.CostEstimate(
        flops=int(max_iter) * (4 * Np * KP * D + 2 * Np * KP),
        transcendentals=int(max_iter) * (Np + KP),
        bytes_accessed=int(max_iter) * Np * D * 4 + (KP + K) * D * 4 + Np * 4,
    )

    protos, idx = pl.pallas_call(
        kernel,
        grid=(int(max_iter), n_chunks),
        in_specs=[
            pl.BlockSpec((KP, D), lambda it, c: (0, 0)),   # initial prototypes
            pl.BlockSpec((C, D), lambda it, c: (c, 0)),    # x streamed in N-chunks
        ],
        out_specs=(
            pl.BlockSpec((K, D), lambda it, c: (0, 0)),    # resident; 1 writeback
            pl.BlockSpec((Np, 1), lambda it, c: (0, 0)),   # resident; 1 writeback
        ),
        out_shape=(
            jax.ShapeDtypeStruct((K, D), jnp.float32),
            jax.ShapeDtypeStruct((Np, 1), jnp.int32),
        ),
        scratch_shapes=[
            pltpu.VMEM((KP, D), jnp.float32),    # current prototypes (padded)
            pltpu.VMEM((KP, D), jnp.bfloat16),   # normalized prototypes (bf16)
            pltpu.VMEM((1, KP), jnp.float32),    # 0.5*||pn||^2 row (+1e30 on pad)
            pltpu.VMEM((KP, D), jnp.float32),    # one_hot^T @ x accumulator
            pltpu.VMEM((KP, 1), jnp.float32),    # per-cluster counts
            pltpu.SMEM((1,), jnp.int32),         # early-stop flag
        ],
        compiler_params=pltpu.CompilerParams(
            dimension_semantics=("arbitrary", "arbitrary")),
        cost_estimate=cost,
    )(p0, x_pad)
    return protos, idx[:N, 0]


if __name__ == "__main__":
    key = jax.random.PRNGKey(0)
    N, D, K = 64, 32, 20
    x = jax.random.normal(key, (N, D), dtype=jnp.float32)

    # single-chunk path (x block fully resident)
    protos, idx = kmeans_unitspace(x, n_clusters=K, max_iter=100)
    protos = jax.block_until_ready(protos)
    idx = jax.block_until_ready(idx)
    assert protos.shape == (K, D) and idx.shape == (N,)
    assert bool(jnp.all(jnp.isfinite(protos)))
    assert bool(jnp.all((idx >= 0) & (idx < K)))

    # multi-chunk path (x streamed from HBM in 16-row chunks)
    protos2, idx2 = kmeans_unitspace(x, n_clusters=K, max_iter=100,
                                     chunk_rows=16)
    protos2 = jax.block_until_ready(protos2)
    idx2 = jax.block_until_ready(idx2)
    assert protos2.shape == (K, D) and idx2.shape == (N,)
    assert bool(jnp.all(jnp.isfinite(protos2)))
    assert bool(jnp.all((idx2 >= 0) & (idx2 < K)))

    print("KERNEL_OK")
</pallas_src>

<mosaic_0001>
module attributes {stable_mosaic.version = 11 : i64} {
  func.func @_kmeans_kernel(%arg0: i32, %arg1: i32, %arg2: memref<128x32xf32, #tpu.memory_space<vmem>>, %arg3: memref<64x32xf32, #tpu.memory_space<vmem>>, %arg4: memref<20x32xf32, #tpu.memory_space<vmem>>, %arg5: memref<64x1xi32, #tpu.memory_space<vmem>>, %arg6: memref<128x32xf32, #tpu.memory_space<vmem>>, %arg7: memref<128x32xbf16, #tpu.memory_space<vmem>>, %arg8: memref<1x128xf32, #tpu.memory_space<vmem>>, %arg9: memref<128x32xf32, #tpu.memory_space<vmem>>, %arg10: memref<128x1xf32, #tpu.memory_space<vmem>>, %arg11: memref<1xi32, #tpu.memory_space<smem>>) attributes {dimension_semantics = [#tpu.dimension_semantics<arbitrary>, #tpu.dimension_semantics<arbitrary>], iteration_bounds = array<i64: 100, 1>, scalar_prefetch = 0 : i64, scratch_operands = 6 : i64, tpu.core_type = #tpu.core_type<tc>, window_params = [{pipeline_mode = #tpu.pipeline_mode<synchronous>, transform_indices = @transform_0, window_bounds = array<i64: 128, 32>}, {transform_indices = @transform_1, window_bounds = array<i64: 64, 32>}, {pipeline_mode = #tpu.pipeline_mode<synchronous>, transform_indices = @transform_2, window_bounds = array<i64: 20, 32>}, {pipeline_mode = #tpu.pipeline_mode<synchronous>, transform_indices = @transform_3, window_bounds = array<i64: 64, 1>}]} {
    %c0_i32 = arith.constant 0 : i32
    %0 = arith.cmpi eq, %arg0, %c0_i32 : i32
    %c0_i32_0 = arith.constant 0 : i32
    %1 = arith.cmpi eq, %arg1, %c0_i32_0 : i32
    %2 = arith.andi %0, %1 : i1
    %3 = arith.extui %2 : i1 to i32
    %c0_i32_1 = arith.constant 0 : i32
    %4 = arith.cmpi ne, %3, %c0_i32_1 : i32
    scf.if %4 {
      %c0_4 = arith.constant 0 : index
      %c0_5 = arith.constant 0 : index
      %9 = vector.load %arg2[%c0_4, %c0_5] : memref<128x32xf32, #tpu.memory_space<vmem>>, vector<128x32xf32>
      %c0_6 = arith.constant 0 : index
      %c0_7 = arith.constant 0 : index
      %10 = vector.load %arg6[%c0_6, %c0_7] : memref<128x32xf32, #tpu.memory_space<vmem>>, vector<128x32xf32>
      tpu.vector_store %arg6[%c0_6, %c0_7], %9 {strides = array<i32>} : memref<128x32xf32, #tpu.memory_space<vmem>>, vector<128x32xf32>,
      %c0_i32_8 = arith.constant 0 : i32
      %c0_9 = arith.constant 0 : index
      %11 = memref.load %arg11[%c0_9] : memref<1xi32, #tpu.memory_space<smem>>
      memref.store %c0_i32_8, %arg11[%c0_9] : memref<1xi32, #tpu.memory_space<smem>>
    } else {
    }
    %c0 = arith.constant 0 : index
    %5 = memref.load %arg11[%c0] : memref<1xi32, #tpu.memory_space<smem>>
    %c0_i32_2 = arith.constant 0 : i32
    %6 = arith.cmpi eq, %5, %c0_i32_2 : i32
    %7 = arith.extui %6 : i1 to i32
    %c0_i32_3 = arith.constant 0 : i32
    %8 = arith.cmpi ne, %7, %c0_i32_3 : i32
    scf.if %8 {
      %c0_i32_4 = arith.constant 0 : i32
      %9 = arith.cmpi eq, %arg1, %c0_i32_4 : i32
      %10 = arith.extui %9 : i1 to i32
      %c0_i32_5 = arith.constant 0 : i32
      %11 = arith.cmpi ne, %10, %c0_i32_5 : i32
      scf.if %11 {
        %c0_30 = arith.constant 0 : index
        %c0_31 = arith.constant 0 : index
        %62 = vector.load %arg6[%c0_30, %c0_31] : memref<128x32xf32, #tpu.memory_space<vmem>>, vector<128x32xf32>
        %63 = arith.mulf %62, %62 : vector<128x32xf32>
        %cst_32 = arith.constant dense<0.000000e+00> : vector<128xf32>
        %64 = vector.multi_reduction <add>, %63, %cst_32 [1] : vector<128x32xf32> to vector<128xf32>
        %65 = vector.shape_cast %64 : vector<128xf32> to vector<128x1xf32>
        %cst_33 = arith.constant 1.000000e-24 : f32
        %66 = vector.broadcast %cst_33 : f32 to vector<128x1xf32>
        %67 = arith.maximumf %65, %66 : vector<128x1xf32>
        %68 = math.rsqrt %67 : vector<128x1xf32>
        %69 = vector.broadcast %68 : vector<128x1xf32> to vector<128x32xf32>
        %70 = arith.mulf %62, %69 : vector<128x32xf32>
        %71 = arith.truncf %70 : vector<128x32xf32> to vector<128x32xbf16>
        %c0_34 = arith.constant 0 : index
        %c0_35 = arith.constant 0 : index
        %72 = vector.load %arg7[%c0_34, %c0_35] : memref<128x32xbf16, #tpu.memory_space<vmem>>, vector<128x32xbf16>
        tpu.vector_store %arg7[%c0_34, %c0_35], %71 {strides = array<i32>} : memref<128x32xbf16, #tpu.memory_space<vmem>>, vector<128x32xbf16>,
        %cst_36 = arith.constant 1.000000e+00 : f32
        %73 = vector.broadcast %cst_36 : f32 to vector<1x32xf32>
        %74 = arith.mulf %70, %70 : vector<128x32xf32>
        %cst_37 = arith.constant dense<0.000000e+00> : vector<1x128xf32>
        %75 = tpu.matmul %73, %74, %cst_37 {dimension_numbers = #tpu.dot_dimension_numbers<[1], [1], [0], [0], [0, 0, 1, 0], [], []>} : vector<1x32xf32>, vector<128x32xf32>, vector<1x128xf32> -> vector<1x128xf32>
        %76 = tpu.iota {dimensions = array<i32: 1>} : vector<1x128xi32>
        %c20_i32 = arith.constant 20 : i32
        %77 = vector.broadcast %c20_i32 : i32 to vector<1x128xi32>
        %78 = arith.cmpi slt, %76, %77 : vector<1x128xi32>
        %cst_38 = arith.constant 5.000000e-01 : f32
        %79 = vector.broadcast %cst_38 : f32 to vector<1x128xf32>
        %80 = arith.mulf %79, %75 : vector<1x128xf32>
        %cst_39 = arith.constant 1.000000e+30 : f32
        %81 = vector.broadcast %cst_39 : f32 to vector<1x128xf32>
        %82 = arith.select %78, %80, %81 : vector<1x128xi1>, vector<1x128xf32>
        %c0_40 = arith.constant 0 : index
        %c0_41 = arith.constant 0 : index
        %83 = vector.load %arg8[%c0_40, %c0_41] : memref<1x128xf32, #tpu.memory_space<vmem>>, vector<1x128xf32>
        tpu.vector_store %arg8[%c0_40, %c0_41], %82 {strides = array<i32>} : memref<1x128xf32, #tpu.memory_space<vmem>>, vector<1x128xf32>,
        %cst_42 = arith.constant 0.000000e+00 : f32
        %84 = vector.broadcast %cst_42 : f32 to vector<128x32xf32>
        %c0_43 = arith.constant 0 : index
        %c0_44 = arith.constant 0 : index
        %85 = vector.load %arg9[%c0_43, %c0_44] : memref<128x32xf32, #tpu.memory_space<vmem>>, vector<128x32xf32>
        tpu.vector_store %arg9[%c0_43, %c0_44], %84 {strides = array<i32>} : memref<128x32xf32, #tpu.memory_space<vmem>>, vector<128x32xf32>,
        %cst_45 = arith.constant 0.000000e+00 : f32
        %86 = vector.broadcast %cst_45 : f32 to vector<128x1xf32>
        %c0_46 = arith.constant 0 : index
        %c0_47 = arith.constant 0 : index
        %87 = vector.load %arg10[%c0_46, %c0_47] : memref<128x1xf32, #tpu.memory_space<vmem>>, vector<128x1xf32>
        tpu.vector_store %arg10[%c0_46, %c0_47], %86 {strides = array<i32>} : memref<128x1xf32, #tpu.memory_space<vmem>>, vector<128x1xf32>,
      } else {
      }
      %c0_6 = arith.constant 0 : index
      %c0_7 = arith.constant 0 : index
      %12 = vector.load %arg3[%c0_6, %c0_7] : memref<64x32xf32, #tpu.memory_space<vmem>>, vector<64x32xf32>
      %13 = arith.mulf %12, %12 : vector<64x32xf32>
      %cst = arith.constant dense<0.000000e+00> : vector<64xf32>
      %14 = vector.multi_reduction <add>, %13, %cst [1] : vector<64x32xf32> to vector<64xf32>
      %15 = vector.shape_cast %14 : vector<64xf32> to vector<64x1xf32>
      %cst_8 = arith.constant 1.000000e-24 : f32
      %16 = vector.broadcast %cst_8 : f32 to vector<64x1xf32>
      %17 = arith.maximumf %15, %16 : vector<64x1xf32>
      %18 = math.rsqrt %17 : vector<64x1xf32>
      %19 = vector.broadcast %18 : vector<64x1xf32> to vector<64x32xf32>
      %20 = arith.mulf %12, %19 : vector<64x32xf32>
      %21 = arith.truncf %20 : vector<64x32xf32> to vector<64x32xbf16>
      %c0_9 = arith.constant 0 : index
      %c0_10 = arith.constant 0 : index
      %22 = vector.load %arg7[%c0_9, %c0_10] : memref<128x32xbf16, #tpu.memory_space<vmem>>, vector<128x32xbf16>
      %cst_11 = arith.constant dense<0.000000e+00> : vector<64x128xf32>
      %23 = tpu.matmul %21, %22, %cst_11 {dimension_numbers = #tpu.dot_dimension_numbers<[1], [1], [0], [0], [0, 0, 1, 0], [], []>} : vector<64x32xbf16>, vector<128x32xbf16>, vector<64x128xf32> -> vector<64x128xf32>
      %c0_12 = arith.constant 0 : index
      %c0_13 = arith.constant 0 : index
      %24 = vector.load %arg8[%c0_12, %c0_13] : memref<1x128xf32, #tpu.memory_space<vmem>>, vector<1x128xf32>
      %25 = vector.broadcast %24 : vector<1x128xf32> to vector<64x128xf32>
      %26 = arith.subf %23, %25 : vector<64x128xf32>
      %cst_14 = arith.constant dense<0xFF800000> : vector<64xf32>
      %27 = vector.multi_reduction <maximumf>, %26, %cst_14 [1] : vector<64x128xf32> to vector<64xf32>
      %28 = vector.shape_cast %27 : vector<64xf32> to vector<64x1xf32>
      %29 = tpu.iota {dimensions = array<i32: 1>} : vector<64x128xi32>
      %30 = vector.broadcast %28 : vector<64x1xf32> to vector<64x128xf32>
      %31 = arith.cmpf oeq, %26, %30 : vector<64x128xf32>
      %c128_i32 = arith.constant 128 : i32
      %32 = vector.broadcast %c128_i32 : i32 to vector<64x128xi32>
      %33 = arith.select %31, %29, %32 : vector<64x128xi1>, vector<64x128xi32>
      %cst_15 = arith.constant dense<2147483647> : vector<64xi32>
      %34 = vector.multi_reduction <minsi>, %33, %cst_15 [1] : vector<64x128xi32> to vector<64xi32>
      %35 = vector.shape_cast %34 : vector<64xi32> to vector<64x1xi32>
      %c64_i32 = arith.constant 64 : i32
      %36 = arith.muli %arg1, %c64_i32 : i32
      %37 = tpu.assume_multiple %36, 64 : i32
      %38 = arith.index_cast %37 : i32 to index
      %c0_16 = arith.constant 0 : index
      %39 = vector.load %arg5[%38, %c0_16] : memref<64x1xi32, #tpu.memory_space<vmem>>, vector<64x1xi32>
      tpu.vector_store %arg5[%38, %c0_16], %35 {strides = array<i32>} : memref<64x1xi32, #tpu.memory_space<vmem>>, vector<64x1xi32>,
      %40 = vector.broadcast %35 : vector<64x1xi32> to vector<64x128xi32>
      %41 = arith.cmpi eq, %29, %40 : vector<64x128xi32>
      %42 = arith.extui %41 : vector<64x128xi1> to vector<64x128xi32>
      %43 = arith.sitofp %42 : vector<64x128xi32> to vector<64x128xf32>
      %44 = tpu.iota {dimensions = array<i32: 0>} : vector<64x1xi32>
      %45 = vector.broadcast %37 : i32 to vector<64x1xi32>
      %46 = arith.addi %45, %44 : vector<64x1xi32>
      %c64_i32_17 = arith.constant 64 : i32
      %47 = vector.broadcast %c64_i32_17 : i32 to vector<64x1xi32>
      %48 = arith.cmpi slt, %46, %47 : vector<64x1xi32>
      %49 = arith.extui %48 : vector<64x1xi1> to vector<64x1xi32>
      %50 = arith.sitofp %49 : vector<64x1xi32> to vector<64x1xf32>
      %c0_18 = arith.constant 0 : index
      %c0_19 = arith.constant 0 : index
      %51 = vector.load %arg9[%c0_18, %c0_19] : memref<128x32xf32, #tpu.memory_space<vmem>>, vector<128x32xf32>
      %cst_20 = arith.constant dense<0.000000e+00> : vector<128x32xf32>
      %52 = tpu.matmul %43, %12, %cst_20 {dimension_numbers = #tpu.dot_dimension_numbers<[0], [0], [1], [1], [0, 1, 1, 1], [], []>} : vector<64x128xf32>, vector<64x32xf32>, vector<128x32xf32> -> vector<128x32xf32>
      %53 = arith.addf %51, %52 : vector<128x32xf32>
      %c0_21 = arith.constant 0 : index
      %c0_22 = arith.constant 0 : index
      %54 = vector.load %arg9[%c0_21, %c0_22] : memref<128x32xf32, #tpu.memory_space<vmem>>, vector<128x32xf32>
      tpu.vector_store %arg9[%c0_21, %c0_22], %53 {strides = array<i32>} : memref<128x32xf32, #tpu.memory_space<vmem>>, vector<128x32xf32>,
      %c0_23 = arith.constant 0 : index
      %c0_24 = arith.constant 0 : index
      %55 = vector.load %arg10[%c0_23, %c0_24] : memref<128x1xf32, #tpu.memory_space<vmem>>, vector<128x1xf32>
      %cst_25 = arith.constant dense<0.000000e+00> : vector<128x1xf32>
      %56 = tpu.matmul %43, %50, %cst_25 {dimension_numbers = #tpu.dot_dimension_numbers<[0], [0], [1], [1], [0, 1, 1, 1], [], []>} : vector<64x128xf32>, vector<64x1xf32>, vector<128x1xf32> -> vector<128x1xf32>
      %57 = arith.addf %55, %56 : vector<128x1xf32>
      %c0_26 = arith.constant 0 : index
      %c0_27 = arith.constant 0 : index
      %58 = vector.load %arg10[%c0_26, %c0_27] : memref<128x1xf32, #tpu.memory_space<vmem>>, vector<128x1xf32>
      tpu.vector_store %arg10[%c0_26, %c0_27], %57 {strides = array<i32>} : memref<128x1xf32, #tpu.memory_space<vmem>>, vector<128x1xf32>,
      %c0_i32_28 = arith.constant 0 : i32
      %59 = arith.cmpi eq, %arg1, %c0_i32_28 : i32
      %60 = arith.extui %59 : i1 to i32
      %c0_i32_29 = arith.constant 0 : i32
      %61 = arith.cmpi ne, %60, %c0_i32_29 : i32
      scf.if %61 {
        %c0_30 = arith.constant 0 : index
        %c0_31 = arith.constant 0 : index
        %62 = vector.load %arg6[%c0_30, %c0_31] : memref<128x32xf32, #tpu.memory_space<vmem>>, vector<128x32xf32>
        %c0_32 = arith.constant 0 : index
        %c0_33 = arith.constant 0 : index
        %63 = vector.load %arg10[%c0_32, %c0_33] : memref<128x1xf32, #tpu.memory_space<vmem>>, vector<128x1xf32>
        %cst_34 = arith.constant 9.99999997E-7 : f32
        %64 = vector.broadcast %cst_34 : f32 to vector<128x1xf32>
        %65 = arith.addf %63, %64 : vector<128x1xf32>
        %66 = tpu.reciprocal %65 {approx = true} : vector<128x1xf32> -> vector<128x1xf32>
        %c0_35 = arith.constant 0 : index
        %c0_36 = arith.constant 0 : index
        %67 = vector.load %arg9[%c0_35, %c0_36] : memref<128x32xf32, #tpu.memory_space<vmem>>, vector<128x32xf32>
        %68 = vector.broadcast %66 : vector<128x1xf32> to vector<128x32xf32>
        %69 = arith.mulf %67, %68 : vector<128x32xf32>
        %70 = arith.subf %69, %62 : vector<128x32xf32>
        %71 = arith.mulf %70, %70 : vector<128x32xf32>
        %72 = vector.shape_cast %71 : vector<128x32xf32> to vector<1x128x32xf32>
        %cst_37 = arith.constant dense<0.000000e+00> : vector<1xf32>
        %73 = vector.multi_reduction <add>, %72, %cst_37 [1, 2] : vector<1x128x32xf32> to vector<1xf32>
        %74 = vector.shape_cast %73 : vector<1xf32> to vector<1x1x1xf32>
        %75 = vector.extract %74[0, 0, 0] : f32 from vector<1x1x1xf32>
        %cst_38 = arith.constant 1.562500e-03 : f32
        %76 = arith.mulf %75, %cst_38 : f32
        %c0_39 = arith.constant 0 : index
        %c0_40 = arith.constant 0 : index
        %77 = vector.load %arg6[%c0_39, %c0_40] : memref<128x32xf32, #tpu.memory_space<vmem>>, vector<128x32xf32>
        tpu.vector_store %arg6[%c0_39, %c0_40], %69 {strides = array<i32>} : memref<128x32xf32, #tpu.memory_space<vmem>>, vector<128x32xf32>,
        %78 = vector.extract_strided_slice %69 {offsets = [0, 0], sizes = [20, 32], strides = [1, 1]} : vector<128x32xf32> to vector<20x32xf32>
        %c0_41 = arith.constant 0 : index
        %c0_42 = arith.constant 0 : index
        %79 = vector.load %arg4[%c0_41, %c0_42] : memref<20x32xf32, #tpu.memory_space<vmem>>, vector<20x32xf32>
        tpu.vector_store %arg4[%c0_41, %c0_42], %78 {strides = array<i32>} : memref<20x32xf32, #tpu.memory_space<vmem>>, vector<20x32xf32>,
        %cst_43 = arith.constant 9.99999974E-6 : f32
        %80 = arith.cmpf olt, %76, %cst_43 : f32
        %81 = arith.extui %80 : i1 to i32
        %c0_i32_44 = arith.constant 0 : i32
        %82 = arith.cmpi ne, %81, %c0_i32_44 : i32
        scf.if %82 {
          %c1_i32 = arith.constant 1 : i32
          %c0_45 = arith.constant 0 : index
          %83 = memref.load %arg11[%c0_45] : memref<1xi32, #tpu.memory_space<smem>>
          memref.store %c1_i32, %arg11[%c0_45] : memref<1xi32, #tpu.memory_space<smem>>
        } else {
        }
      } else {
      }
    } else {
    }
    return
  }
  func.func @transform_0(%arg0: i32, %arg1: i32) -> (i32, i32) {
    %c0_i32 = arith.constant 0 : i32
    %c0_i32_0 = arith.constant 0 : i32
    %c0_i32_1 = arith.constant 0 : i32
    return %c0_i32, %c0_i32_0 : i32, i32
  }
  func.func @transform_1(%arg0: i32, %arg1: i32) -> (i32, i32) {
    %c0_i32 = arith.constant 0 : i32
    %c0_i32_0 = arith.constant 0 : i32
    return %arg1, %c0_i32 : i32, i32
  }
  func.func @transform_2(%arg0: i32, %arg1: i32) -> (i32, i32) {
    %c0_i32 = arith.constant 0 : i32
    %c0_i32_0 = arith.constant 0 : i32
    %c0_i32_1 = arith.constant 0 : i32
    return %c0_i32, %c0_i32_0 : i32, i32
  }
  func.func @transform_3(%arg0: i32, %arg1: i32) -> (i32, i32) {
    %c0_i32 = arith.constant 0 : i32
    %c0_i32_0 = arith.constant 0 : i32
    %c0_i32_1 = arith.constant 0 : i32
    return %c0_i32, %c0_i32_0 : i32, i32
  }
}

</mosaic_0001>

<bundles_post_ra>
// kernel: tpu_custom_call.1
= control target key start
LH: loop header
LB: loop body
LE: loop exit
PB: predicated region body
PF: predicated region fallthrough
CT: control target
= control target key end

     0   :  { %9 = vsyncpa [#allocation9], 0  ;;  %s2139_s12 = smov 0   ;;  %s2141_s13 = smov 0   ;;  %s3151_s0 = inlined_call_operand.vmem [shape: f32[128,32], index: 0, kind: input, shape index: {}]   ;;  %s3152_s1 = inlined_call_operand.vmem [shape: f32[64,32], index: 1, kind: input, shape index: {}]   ;;  %s3153_s2 = inlined_call_operand.hbm [shape: f32[20,32], index: 2, kind: output, shape index: {0}]   ;;  %s3154_s3 = inlined_call_operand.vmem [shape: s32[64,1], index: 3, kind: output, shape index: {1}]  }
   0x1   :  { %s2143_s14 = smov 0  }
   0x2 LB: > { %s1802_s15 = sadd.s32 4294967295, %s2109_s14   ;;  %s27_s16 = sadd.s32 1, %s2105_s13  ;;  %s2109_s14 = sphi %s2143_s14, %s15_s14   ;;  %s2105_s13 = sphi %s2141_s13, %s3190_s13   ;;  %s2101_s12 = sphi %s2139_s12, %s3189_s12  }
   0x3   : > { %p29_p0 = scmp.ge.s32.totalorder %s27_s16, 100  ;;  %p1805_p1 = scmp.ge.s32.totalorder %s2109_s14, 1 }
   0x4   : > { %p144_p2 = scmp.lt.s32.totalorder %s2109_s14, 101 }
   0x5   : > { %s3192_s16 = smov (%p29_p0, %s27_s16), 0 }
   0x6   : > { %p145_p3 = pnand %p1805_p1, %p144_p2 }
   0x7   : > { %p169_p4 = scmp.eq.s32.totalorder (!%p145_p3), %s2101_s12, 0 }
   0x8   : > { %148 = sbr.rel (%p145_p3) target bundleno = 1509 (0x5e5), region = 28 }
   0xd   : > { %174 = sbr.rel (!%p169_p4) target bundleno = 30 (0x1e), region = 32  ;;  %v175_v0 = vld [vmem:[%s3151_s0] sm:$0xff] (%p169_p4)  ;;  %vm191_vm0 = vcmask (%p169_p4), 261120   ;;  %v176_v1 = vld [vmem:[%s3151_s0 + $0x8] sm:$0xff] (%p169_p4)  ;;  %v177_v2 = vld [vmem:[%s3151_s0 + $0x10] sm:$0xff] (%p169_p4)  ;;  %s2111_s25 = smov (%p169_p4), 0  }
   0xe   : > { %192 = vst.msk [vmem:[#allocation2] sm:$0xff] (%p169_p4), %vm191_vm0, %v175_v0  ;;  %v178_v3 = vld [vmem:[%s3151_s0 + $0x18] sm:$0xff] (%p169_p4)  ;;  %209 = sst [smem:[#allocation7]] (%p169_p4), %s2111_s25  ;;  %v179_v4 = vld [vmem:[%s3151_s0 + $0x20] sm:$0xff] (%p169_p4)  ;;  %v180_v5 = vld [vmem:[%s3151_s0 + $0x28] sm:$0xff] (%p169_p4) }
   0xf   : > { %193 = vst.msk [vmem:[#allocation2 + $0x8] sm:$0xff] (%p169_p4), %vm191_vm0, %v176_v1  ;;  %v181_v6 = vld [vmem:[%s3151_s0 + $0x30] sm:$0xff] (%p169_p4)  ;;  %v182_v7 = vld [vmem:[%s3151_s0 + $0x38] sm:$0xff] (%p169_p4)  ;;  %v183_v8 = vld [vmem:[%s3151_s0 + $0x40] sm:$0xff] (%p169_p4) }
  0x10   : > { %194 = vst.msk [vmem:[#allocation2 + $0x10] sm:$0xff] (%p169_p4), %vm191_vm0, %v177_v2  ;;  %v184_v9 = vld [vmem:[%s3151_s0 + $0x48] sm:$0xff] (%p169_p4)  ;;  %v185_v10 = vld [vmem:[%s3151_s0 + $0x50] sm:$0xff] (%p169_p4)  ;;  %v186_v11 = vld [vmem:[%s3151_s0 + $0x58] sm:$0xff] (%p169_p4) }
  0x11   : > { %195 = vst.msk [vmem:[#allocation2 + $0x18] sm:$0xff] (%p169_p4), %vm191_vm0, %v178_v3  ;;  %v187_v12 = vld [vmem:[%s3151_s0 + $0x60] sm:$0xff] (%p169_p4)  ;;  %v188_v13 = vld [vmem:[%s3151_s0 + $0x68] sm:$0xff] (%p169_p4)  ;;  %v189_v14 = vld [vmem:[%s3151_s0 + $0x70] sm:$0xff] (%p169_p4) }
  0x12   : > { %196 = vst.msk [vmem:[#allocation2 + $0x20] sm:$0xff] %vm191_vm0, %v179_v4  ;;  %v190_v15 = vld [vmem:[%s3151_s0 + $0x78] sm:$0xff] }
  0x13   : > { %197 = vst.msk [vmem:[#allocation2 + $0x28] sm:$0xff] %vm191_vm0, %v180_v5 }
  0x14   : > { %198 = vst.msk [vmem:[#allocation2 + $0x30] sm:$0xff] %vm191_vm0, %v181_v6 }
  0x15   : > { %199 = vst.msk [vmem:[#allocation2 + $0x38] sm:$0xff] %vm191_vm0, %v182_v7 }
  0x16   : > { %200 = vst.msk [vmem:[#allocation2 + $0x40] sm:$0xff] %vm191_vm0, %v183_v8 }
  0x17   : > { %201 = vst.msk [vmem:[#allocation2 + $0x48] sm:$0xff] %vm191_vm0, %v184_v9 }
  0x18   : > { %202 = vst.msk [vmem:[#allocation2 + $0x50] sm:$0xff] %vm191_vm0, %v185_v10 }
  0x19   : > { %203 = vst.msk [vmem:[#allocation2 + $0x58] sm:$0xff] %vm191_vm0, %v186_v11 }
  0x1a   : > { %204 = vst.msk [vmem:[#allocation2 + $0x60] sm:$0xff] %vm191_vm0, %v187_v12 }
  0x1b   : > { %205 = vst.msk [vmem:[#allocation2 + $0x68] sm:$0xff] %vm191_vm0, %v188_v13 }
  0x1c   : > { %206 = vst.msk [vmem:[#allocation2 + $0x70] sm:$0xff] %vm191_vm0, %v189_v14 }
  0x1d   : > { %207 = vst.msk [vmem:[#allocation2 + $0x78] sm:$0xff] %vm191_vm0, %v190_v15 }
  0x1e PF: > { %s210_s27 = sld [smem:[#allocation7]] }
  0x24   : > { %p1807_p5 = scmp.ne.s32.totalorder %s210_s27, 0 }
  0x25   : > { %s2115_s12 = smov (!%p1807_p5), 1  }
  0x26   : > { %214 = sbr.rel (%p1807_p5) target bundleno = 1503 (0x5df), region = 36 }
  0x2b   : > { %v2222_v16 = vld [vmem:[#allocation2 + $0x70] sm:$0xff]  ;;  %vm250_vm1 = vcmask 261120   ;;  %v2224_v17 = vld [vmem:[#allocation2 + $0x60] sm:$0xff]  ;;  %v2234_v22 = vld [vmem:[#allocation2 + $0x78] sm:$0xff]  ;;  %vm507_vm3 = vcmask 257024  }
  0x2c   : > { %v2226_v18 = vld [vmem:[#allocation2 + $0x50] sm:$0xff]  ;;  %v248_v19 = vmul.f32 %v2222_v16, %v2222_v16  ;;  %v246_v20 = vmul.f32 %v2224_v17, %v2224_v17  ;;  %v2236_v23 = vld [vmem:[#allocation2 + $0x68] sm:$0xff]  ;;  %v2241_v27 = vld [vmem:[#allocation2 + $0x58] sm:$0xff]  ;;  %v249_v28 = vmul.f32 %v2234_v22, %v2234_v22 }
  0x2d   : > { %v244_v21 = vmul.f32 %v2226_v18, %v2226_v18  ;;  %v247_v29 = vmul.f32 %v2236_v23, %v2236_v23  ;;  %v245_v30 = vmul.f32 %v2241_v27, %v2241_v27  ;;  %v2252_v34 = vld [vmem:[#allocation2 + $0x48] sm:$0xff]  ;;  %v2254_v35 = vld [vmem:[#allocation2 + $0x40] sm:$0xff]  ;;  %v2256_v36 = vld [vmem:[#allocation2 + $0x30] sm:$0xff] }
  0x2e   : > { %v293_v24 = vsel %vm250_vm1, %v248_v19, 0.0  ;;  %v287_v25 = vsel %vm250_vm1, %v246_v20, 0.0  ;;  %v296_v31 = vsel %vm250_vm1, %v249_v28, 0.0  ;;  %v243_v37 = vmul.f32 %v2252_v34, %v2252_v34  ;;  %v2266_v42 = vld [vmem:[#allocation2 + $0x38] sm:$0xff]  ;;  %v2269_v44 = vld [vmem:[#allocation2 + $0x20] sm:$0xff]  ;;  %v2271_v45 = vld [vmem:[#allocation2 + $0x28] sm:$0xff] }
  0x2f   : > { %v281_v26 = vsel %vm250_vm1, %v244_v21, 0.0  ;;  %294 = vadd.xlane.f32.xlu0 %v293_v24  ;;  %288 = vadd.xlane.f32.xlu1 %v287_v25  ;;  %v290_v32 = vsel %vm250_vm1, %v247_v29, 0.0  ;;  %v284_v33 = vsel %vm250_vm1, %v245_v30, 0.0  ;;  %v242_v38 = vmul.f32 %v2254_v35, %v2254_v35  ;;  %v2282_v52 = vld [vmem:[#allocation2 + $0x18] sm:$0xff]  ;;  %v2284_v53 = vld [vmem:[#allocation2 + $0x10] sm:$0xff]  ;;  %v2286_v54 = vld [vmem:[#allocation2] sm:$0xff] }
  0x30   : > { %282 = vadd.xlane.f32.xlu2 %v281_v26  ;;  %v240_v39 = vmul.f32 %v2256_v36, %v2256_v36  ;;  %v278_v40 = vsel %vm250_vm1, %v243_v37, 0.0  ;;  %v241_v46 = vmul.f32 %v2266_v42, %v2266_v42  ;;  %v238_v47 = vmul.f32 %v2269_v44, %v2269_v44  ;;  %v2296_v60 = vld [vmem:[#allocation2 + $0x8] sm:$0xff]  ;;  %v2302_v62 = vld [vmem:[%s3152_s1] sm:$0xff]  ;;  %v2321_v6 = vld [vmem:[%s3152_s1 + $0x18] sm:$0xff] }
  0x31   : > { %v275_v41 = vsel %vm250_vm1, %v242_v38, 0.0  ;;  %v239_v48 = vmul.f32 %v2271_v45, %v2271_v45  ;;  %v237_v55 = vmul.f32 %v2282_v52, %v2282_v52  ;;  %v236_v56 = vmul.f32 %v2284_v53, %v2284_v53  ;;  %v2307_v63 = vld [vmem:[%s3152_s1 + $0x8] sm:$0xff]  ;;  %v2326_v7 = vld [vmem:[%s3152_s1 + $0x10] sm:$0xff]  ;;  %v2331_v8 = vld [vmem:[%s3152_s1 + $0x20] sm:$0xff] }
  0x32   : > { %v269_v43 = vsel %vm250_vm1, %v240_v39, 0.0  ;;  %v272_v49 = vsel %vm250_vm1, %v241_v46, 0.0  ;;  %v263_v50 = vsel %vm250_vm1, %v238_v47, 0.0  ;;  %v234_v57 = vmul.f32 %v2286_v54, %v2286_v54  ;;  %v2344_v14 = vld [vmem:[%s3152_s1 + $0x28] sm:$0xff]  ;;  %v2353_v21 = vld [vmem:[%s3152_s1 + $0x30] sm:$0xff]  ;;  %v2358_v24 = vld [vmem:[%s3152_s1 + $0x38] sm:$0xff] }
  0x33   : > { %v266_v51 = vsel %vm250_vm1, %v239_v48, 0.0  ;;  %v260_v58 = vsel %vm250_vm1, %v237_v55, 0.0  ;;  %v257_v59 = vsel %vm250_vm1, %v236_v56, 0.0  ;;  %v235_v0 = vmul.f32 %v2296_v60, %v2296_v60  ;;  %1914 = vmatpush.msra.mxu2 %v2358_v24 }
  0x34   : > { %v251_v61 = vsel %vm250_vm1, %v234_v57, 0.0  ;;  %v658_v1 = vmul.f32 %v2302_v62, %v2302_v62  ;;  %v659_v2 = vmul.f32 %v2307_v63, %v2307_v63  ;;  %v661_v9 = vmul.f32 %v2321_v6, %v2321_v6 }
  0x35   : > { %v254_v3 = vsel %vm250_vm1, %v235_v0, 0.0  ;;  %v660_v10 = vmul.f32 %v2326_v7, %v2326_v7  ;;  %v662_v11 = vmul.f32 %v2331_v8, %v2331_v8  ;;  %v663_v19 = vmul.f32 %v2344_v14, %v2344_v14  ;;  %1915 = vmatpush.msra.mxu2 %v2353_v21 }
  0x36   : > { %v667_v4 = vsel %vm250_vm1, %v658_v1, 0.0  ;;  %v670_v5 = vsel %vm250_vm1, %v659_v2, 0.0  ;;  %v676_v12 = vsel %vm250_vm1, %v661_v9, 0.0  ;;  %v664_v25 = vmul.f32 %v2353_v21, %v2353_v21 }
  0x37   : > { %297 = vadd.xlane.f32.xlu0 %v296_v31  ;;  %291 = vadd.xlane.f32.xlu1 %v290_v32  ;;  %v673_v13 = vsel %vm250_vm1, %v660_v10, 0.0  ;;  %v679_v15 = vsel %vm250_vm1, %v662_v11, 0.0  ;;  %v682_v20 = vsel %vm250_vm1, %v663_v19, 0.0  ;;  %v665_v26 = vmul.f32 %v2358_v24, %v2358_v24 }
  0x38   : > { %285 = vadd.xlane.f32.xlu2 %v284_v33  ;;  %v685_v28 = vsel %vm250_vm1, %v664_v25, 0.0  ;;  %1916 = vmatpush.msra.mxu2 %v2344_v14 }
  0x39   : > { %v688_v29 = vsel %vm250_vm1, %v665_v26, 0.0 }
  0x3a   : > { %1917 = vmatpush.msra.mxu2 %v2331_v8 }
  0x3c   : > { %1918 = vmatpush.msra.mxu2 %v2321_v6 }
  0x3e   : > { %1919 = vmatpush.msra.mxu2 %v2326_v7 }
  0x3f   : > { %279 = vadd.xlane.f32.xlu1 %v278_v40  ;;  %276 = vadd.xlane.f32.xlu0 %v275_v41 }
  0x40   : > { %270 = vadd.xlane.f32.xlu2 %v269_v43  ;;  %1920 = vmatpush.msra.mxu2 %v2307_v63 }
  0x42   : > { %1921 = vmatpush.msra.mxu2 %v2302_v62 }
  0x47   : > { %273 = vadd.xlane.f32.xlu0 %v272_v49  ;;  %264 = vadd.xlane.f32.xlu1 %v263_v50 }
  0x48   : > { %267 = vadd.xlane.f32.xlu2 %v266_v51 }
  0x4f   : > { %261 = vadd.xlane.f32.xlu1 %v260_v58  ;;  %258 = vadd.xlane.f32.xlu0 %v257_v59 }
  0x50   : > { %252 = vadd.xlane.f32.xlu2 %v251_v61 }
  0x57   : > { %255 = vadd.xlane.f32.xlu0 %v254_v3  ;;  %668 = vadd.xlane.f32.xlu1 %v667_v4 }
  0x58   : > { %671 = vadd.xlane.f32.xlu2 %v670_v5 }
  0x5f   : > { %677 = vadd.xlane.f32.xlu1 %v676_v12  ;;  %674 = vadd.xlane.f32.xlu0 %v673_v13 }
  0x60   : > { %680 = vadd.xlane.f32.xlu2 %v679_v15 }
  0x67   : > { %683 = vadd.xlane.f32.xlu0 %v682_v20  ;;  %686 = vadd.xlane.f32.xlu1 %v685_v28 }
  0x68   : > { %689 = vadd.xlane.f32.xlu2 %v688_v29 }
  0xa2   : > { %v295_v30 = vpop.xlane.xlu0 %294  ;;  %v289_v31 = vpop.xlane.xlu1 %288 }
  0xa3   : > { %v313_v32 = vmax.f32 %v295_v30, 1e-24  ;;  %v2374_v33 = vmax.f32 %v289_v31, 1e-24  ;;  %v283_v37 = vpop.xlane.xlu2 %282 }
  0xa4   : > { %v2376_v38 = vmax.f32 %v283_v37, 1e-24 }
  0xa5   : > { %1975 = vrsqrt.f32 %v313_v32  ;;  %vm461_vm4 = vweird.f32 %v313_v32  ;;  %vm441_vm5 = vweird.f32 %v2374_v33 }
  0xa6   : > { %1977 = vrsqrt.f32 %v2374_v33  ;;  %vm421_vm6 = vweird.f32 %v2376_v38 }
  0xa7   : > { %1979 = vrsqrt.f32 %v2376_v38 }
  0xaa   : > { %v298_v39 = vpop.xlane.xlu0 %297  ;;  %v292_v40 = vpop.xlane.xlu1 %291 }
  0xab   : > { %v1976_v41 = vpop.eup %1975  ;;  %v2380_v43 = vmax.f32 %v298_v39, 1e-24  ;;  %v2382_v46 = vmax.f32 %v292_v40, 1e-24  ;;  %v286_v47 = vpop.xlane.xlu2 %285 }
  0xac   : > { %v2384_v48 = vpop.eup %1977  ;;  %v456_v49 = vmul.f32 %v1976_v41, %v313_v32  ;;  %v2386_v50 = vmax.f32 %v286_v47, 1e-24  ;;  %vm462_vm2 = vweird.f32 %v1976_v41 }
  0xad   : > { %v2388_v51 = vpop.eup %1979  ;;  %1981 = vrsqrt.f32 %v2380_v43  ;;  %v436_v56 = vmul.f32 %v2384_v48, %v2374_v33  ;;  %vm463_vm7 = vmor %vm461_vm4, %vm462_vm2  ;;  %vm442_vm8 = vweird.f32 %v2384_v48  ;;  %vm471_vm9 = vweird.f32 %v2380_v43 }
  0xae   : > { %v457_v55 = vmul.f32 %v1976_v41, %v456_v49  ;;  %v416_v57 = vmul.f32 %v2388_v51, %v2376_v38  ;;  %1983 = vrsqrt.f32 %v2382_v46  ;;  %vm422_vm10 = vweird.f32 %v2388_v51  ;;  %vm2467_vm0 = vmor %vm441_vm5, %vm442_vm8 }
  0xaf   : > { %1985 = vrsqrt.f32 %v2386_v50  ;;  %v437_v61 = vmul.f32 %v2384_v48, %v436_v56  ;;  %vm451_vm11 = vweird.f32 %v2382_v46  ;;  %vm431_vm15 = vweird.f32 %v2386_v50  ;;  %vm2494_vm5 = vmor %vm421_vm6, %vm422_vm10 }
  0xb0   : > { %v458_v58 = vmul.f32 0.5, %v457_v55  ;;  %v417_v0 = vmul.f32 %v2388_v51, %v416_v57 }
  0xb1   : > { %v438_v19 = vmul.f32 0.5, %v437_v61 }
  0xb2   : > { %v459_v59 = vsub.f32 1.5, %v458_v58  ;;  %v280_v1 = vpop.xlane.xlu1 %279  ;;  %v277_v2 = vpop.xlane.xlu0 %276  ;;  %v418_v20 = vmul.f32 0.5, %v417_v0 }
  0xb3   : > { %v2399_v3 = vpop.eup %1981  ;;  %v2401_v4 = vmax.f32 %v280_v1, 1e-24  ;;  %v2403_v5 = vmax.f32 %v277_v2, 1e-24  ;;  %v271_v9 = vpop.xlane.xlu2 %270  ;;  %v439_v40 = vsub.f32 1.5, %v438_v19 }
  0xb4   : > { %v2405_v10 = vpop.eup %1983  ;;  %v460_v11 = vmul.f32 %v1976_v41, %v459_v59  ;;  %v466_v12 = vmul.f32 %v2399_v3, %v2380_v43  ;;  %v2424_v30 = vmax.f32 %v271_v9, 1e-24  ;;  %v419_v47 = vsub.f32 1.5, %v418_v20 }
  0xb5   : > { %v2409_v13 = vpop.eup %1985  ;;  %v446_v15 = vmul.f32 %v2405_v10, %v2382_v46  ;;  %1987 = vrsqrt.f32 %v2401_v4  ;;  %vm472_vm12 = vweird.f32 %v2399_v3  ;;  %vm452_vm13 = vweird.f32 %v2405_v10 }
  0xb6   : > { %v467_v25 = vmul.f32 %v2399_v3, %v466_v12  ;;  %v426_v26 = vmul.f32 %v2409_v13, %v2386_v50  ;;  %1989 = vrsqrt.f32 %v2403_v5  ;;  %v464_v31 = vsel %vm463_vm7, %v1976_v41, %v460_v11  ;;  %vm473_vm14 = vmor %vm471_vm9, %vm472_vm12 }
  0xb7   : > { %v447_v28 = vmul.f32 %v2405_v10, %v446_v15  ;;  %v2429_v39 = vmul.f32 %v464_v31, %v2222_v16  ;;  %1991 = vrsqrt.f32 %v2424_v30  ;;  %v2453_v15 = vmul.f32 %v2384_v48, %v439_v40  ;;  %vm2483_vm4 = vmor %vm451_vm11, %vm452_vm13 }
  0xb8   : > { %v468_v29 = vmul.f32 0.5, %v467_v25  ;;  %v427_v37 = vmul.f32 %v2409_v13, %v426_v26  ;;  %v2472_v26 = vmul.f32 %v2388_v51, %v419_v47  ;;  %vm432_vm2 = vweird.f32 %v2409_v13 }
  0xb9   : > { %v448_v32 = vmul.f32 0.5, %v447_v28  ;;  %v505_v61 = vpack.c.bf16 %v2429_v39, %v2429_v39  ;;  %vm411_vm7 = vweird.f32 %v2401_v4  ;;  %vm401_vm8 = vweird.f32 %v2403_v5  ;;  %vm2536_vm9 = vmor %vm431_vm15, %vm432_vm2 }
  0xba   : > { %v469_v49 = vsub.f32 1.5, %v468_v29  ;;  %v274_v55 = vpop.xlane.xlu0 %273  ;;  %v265_v56 = vpop.xlane.xlu1 %264  ;;  %v428_v11 = vmul.f32 0.5, %v427_v37  ;;  %vm381_vm12 = vweird.f32 %v2424_v30 }
  0xbb   : > { %v2432_v57 = vpop.eup %1987  ;;  %v449_v41 = vsub.f32 1.5, %v448_v32  ;;  %v2435_v58 = vmax.f32 %v274_v55, 1e-24  ;;  %v268_v59 = vpop.xlane.xlu2 %267  ;;  %v2443_v1 = vmax.f32 %v265_v56, 1e-24  ;;  %v444_v55 = vsel %vm2467_vm0, %v2384_v48, %v2453_v15 }
  0xbc   : > { %v406_v16 = vmul.f32 %v2432_v57, %v2401_v4  ;;  %v470_v0 = vmul.f32 %v2399_v3, %v469_v49  ;;  %v2445_v2 = vpop.eup %1989  ;;  %v2449_v12 = vmax.f32 %v268_v59, 1e-24  ;;  %522 = vst.msk [vmem:[#allocation3 + $0x38] sm:$0xf] %vm507_vm3, %v505_v61  ;;  %v429_v46 = vsub.f32 1.5, %v428_v11 }
  0xbd   : > { %v450_v9 = vmul.f32 %v2405_v10, %v449_v41  ;;  %1993 = vrsqrt.f32 %v2435_v58  ;;  %v396_v20 = vmul.f32 %v2445_v2, %v2403_v5  ;;  %v2477_v28 = vpop.eup %1991  ;;  %v424_v48 = vsel %vm2494_vm5, %v2388_v51, %v2472_v26 }
  0xbe   : > { %v407_v19 = vmul.f32 %v2432_v57, %v406_v16  ;;  %v474_v43 = vsel %vm473_vm14, %v2399_v3, %v470_v0  ;;  %1995 = vrsqrt.f32 %v2449_v12  ;;  %v376_v37 = vmul.f32 %v2477_v28, %v2424_v30 }
  0xbf   : > { %v397_v31 = vmul.f32 %v2445_v2, %v396_v20  ;;  %v490_v32 = vmul.f32 %v474_v43, %v2234_v22  ;;  %1997 = vrsqrt.f32 %v2443_v1  ;;  %v454_v22 = vsel %vm2483_vm4, %v2405_v10, %v450_v9 }
  0xc0   : > { %v408_v29 = vmul.f32 0.5, %v407_v19  ;;  %v377_v59 = vmul.f32 %v2477_v28, %v376_v37  ;;  %v488_v61 = vmul.f32 %v454_v22, %v2236_v23  ;;  %v430_v23 = vmul.f32 %v2409_v13, %v429_v46 }
  0xc1   : > { %v506_v40 = vpack.c.bf16 %v490_v32, %v490_v32  ;;  %v539_v47 = vmul.f32 %v490_v32, %v490_v32  ;;  %v398_v10 = vmul.f32 0.5, %v397_v31  ;;  %vm412_vm6 = vweird.f32 %v2432_v57 }
  0xc2   : > { %v262_v49 = vpop.xlane.xlu1 %261  ;;  %v259_v38 = vpop.xlane.xlu0 %258  ;;  %v409_v41 = vsub.f32 1.5, %v408_v29  ;;  %v504_v15 = vpack.c.bf16 %v488_v61, %v488_v61  ;;  %v378_v43 = vmul.f32 0.5, %v377_v59  ;;  %v538_v29 = vmul.f32 %v2429_v39, %v2429_v39  ;;  %vm2575_vm2 = vmor %vm411_vm7, %vm412_vm6 }
  0xc3   : > { %v2509_v56 = vpop.eup %1993  ;;  %v2513_v16 = vmax.f32 %v262_v49, 1e-24  ;;  %523 = vst.msk [vmem:[#allocation3 + $0x3c] sm:$0xf] %vm507_vm3, %v506_v40  ;;  %1808 = vmatpush.xpose.msk.msra.mxu0 %vm250_vm1, %v539_v47  ;;  %v2519_v9 = vmax.f32 %v259_v38, 1e-24  ;;  %vm402_vm10 = vweird.f32 %v2445_v2  ;;  %vm391_vm11 = vweird.f32 %v2435_v58  ;;  %v253_v39 = vpop.xlane.xlu2 %252 }
  0xc4   : > { %v386_v0 = vmul.f32 %v2509_v56, %v2435_v58  ;;  %v2525_v11 = vpop.eup %1995  ;;  %v410_v31 = vmul.f32 %v2432_v57, %v409_v41  ;;  %521 = vst.msk [vmem:[#allocation3 + $0x34] sm:$0xf] %vm507_vm3, %v504_v15  ;;  %v399_v32 = vsub.f32 1.5, %v398_v10  ;;  %vm382_vm13 = vweird.f32 %v2477_v28 }
  0xc5   : > { %1999 = vrsqrt.f32 %v2513_v16  ;;  %v2530_v19 = vpop.eup %1997  ;;  %v366_v33 = vmul.f32 %v2525_v11, %v2449_v12  ;;  %vm392_vm14 = vweird.f32 %v2509_v56  ;;  %vm371_vm15 = vweird.f32 %v2449_v12  ;;  %vm2637_vm5 = vmor %vm381_vm12, %vm382_vm13 }
  0xc6   : > { %v387_v25 = vmul.f32 %v2509_v56, %v386_v0  ;;  %v356_v50 = vmul.f32 %v2530_v19, %v2443_v1  ;;  %2001 = vrsqrt.f32 %v2519_v9  ;;  %v487_v40 = vmul.f32 %v444_v55, %v2224_v17  ;;  %vm2602_vm6 = vmor %vm391_vm11, %vm392_vm14 }
  0xc7   : > { %v367_v37 = vmul.f32 %v2525_v11, %v366_v33  ;;  %1809 = vmatpush.xpose.msk.msra.mxu0 %vm250_vm1, %v538_v29  ;;  %v434_v47 = vsel %vm2536_vm9, %v2409_v13, %v430_v23  ;;  %v379_v38 = vsub.f32 1.5, %v378_v43  ;;  %vm361_vm0 = vweird.f32 %v2443_v1  ;;  %vm2588_vm9 = vmor %vm401_vm8, %vm402_vm10 }
  0xc8   : > { %v388_v46 = vmul.f32 0.5, %v387_v25  ;;  %v357_v22 = vmul.f32 %v2530_v19, %v356_v50  ;;  %v537_v41 = vmul.f32 %v488_v61, %v488_v61  ;;  %v486_v59 = vmul.f32 %v434_v47, %v2241_v27 }
  0xc9   : > { %v368_v15 = vmul.f32 0.5, %v367_v37  ;;  %v503_v33 = vpack.c.bf16 %v487_v40, %v487_v40  ;;  %v2569_v17 = vmax.f32 %v253_v39, 1e-24  ;;  %v400_v27 = vmul.f32 %v2445_v2, %v399_v32 }
  0xca   : > { %v389_v49 = vsub.f32 1.5, %v388_v46  ;;  %v256_v10 = vpop.xlane.xlu0 %255  ;;  %v1913_v25 = vld [vmem:[#allocation3 + $0x38] sm:$0xff]  ;;  %vm372_vm4 = vweird.f32 %v2525_v11  ;;  %v358_v55 = vmul.f32 0.5, %v357_v22  ;;  %vm362_vm7 = vweird.f32 %v2530_v19 }
  0xcb   : > { %v2565_v0 = vpop.eup %1999  ;;  %v2567_v29 = vmax.f32 %v256_v10, 1e-24  ;;  %1810 = vmatpush.xpose.msk.msra.mxu0 %vm250_vm1, %v537_v41  ;;  %v881_v20 = vsel %vm250_vm1, %v1913_v25, 0  ;;  %520 = vst.msk [vmem:[#allocation3 + $0x30] sm:$0xf] %vm507_vm3, %v503_v33  ;;  %v502_v43 = vpack.c.bf16 %v486_v59, %v486_v59  ;;  %vm351_vm8 = vweird.f32 %v2513_v16  ;;  %vm2652_vm11 = vmor %vm371_vm15, %vm372_vm4 }
  0xcc   : > { %v346_v61 = vmul.f32 %v2565_v0, %v2513_v16  ;;  %v390_v23 = vmul.f32 %v2509_v56, %v389_v49  ;;  %v2596_v50 = vpop.eup %2001  ;;  %883 = vmatpush.bf16.xpose.msra.mxu1 %v881_v20  ;;  %v536_v46 = vmul.f32 %v487_v40, %v487_v40  ;;  %v380_v37 = vmul.f32 %v2477_v28, %v379_v38  ;;  %vm2665_vm12 = vmor %vm361_vm0, %vm362_vm7 }
  0xcd   : > { %2003 = vrsqrt.f32 %v2567_v29  ;;  %v369_v39 = vsub.f32 1.5, %v368_v15  ;;  %v336_v22 = vmul.f32 %v2596_v50, %v2519_v9  ;;  %519 = vst.msk [vmem:[#allocation3 + $0x2c] sm:$0xf] %vm507_vm3, %v502_v43  ;;  %v359_v58 = vsub.f32 1.5, %v358_v55 }
  0xce   : > { %v347_v32 = vmul.f32 %v2565_v0, %v346_v61  ;;  %2005 = vrsqrt.f32 %v2569_v17  ;;  %v485_v40 = vmul.f32 %v424_v48, %v2226_v18  ;;  %v414_v49 = vsel %vm2575_vm2, %v2432_v57, %v410_v31 }
  0xcf   : > { %1811 = vmatpush.xpose.msk.msra.mxu0 %vm250_vm1, %v536_v46  ;;  %v337_v38 = vmul.f32 %v2596_v50, %v336_v22  ;;  %v484_v41 = vmul.f32 %v414_v49, %v2252_v34  ;;  %v404_v10 = vsel %vm2588_vm9, %v2445_v2, %v400_v27  ;;  %v394_v3 = vsel %vm2602_vm6, %v2509_v56, %v390_v23 }
  0xd0   : > { %v348_v47 = vmul.f32 0.5, %v347_v32  ;;  %v535_v25 = vmul.f32 %v486_v59, %v486_v59  ;;  %v501_v51 = vpack.c.bf16 %v485_v40, %v485_v40  ;;  %v483_v18 = vmul.f32 %v404_v10, %v2254_v35 }
  0xd1   : > { %vm352_vm10 = vweird.f32 %v2565_v0  ;;  %v338_v34 = vmul.f32 0.5, %v337_v38  ;;  %v500_v2 = vpack.c.bf16 %v484_v41, %v484_v41  ;;  %v2643_v26 = vmul.f32 %v394_v3, %v2266_v42 }
  0xd2   : > { %v349_v15 = vsub.f32 1.5, %v348_v47  ;;  %v370_v48 = vmul.f32 %v2525_v11, %v369_v39  ;;  %v360_v30 = vmul.f32 %v2530_v19, %v359_v58  ;;  %v1912_v31 = vld [vmem:[#allocation3 + $0x30] sm:$0xff]  ;;  %518 = vst.msk [vmem:[#allocation3 + $0x28] sm:$0xf] %vm507_vm3, %v501_v51  ;;  %v499_v42 = vpack.c.bf16 %v483_v18, %v483_v18  ;;  %vm2679_vm13 = vmor %vm351_vm8, %vm352_vm10 }
  0xd3   : > { %v2645_v56 = vpop.eup %2003  ;;  %1812 = vmatpush.xpose.msk.msra.mxu0 %vm250_vm1, %v535_v25  ;;  %v339_v13 = vsub.f32 1.5, %v338_v34  ;;  %517 = vst.msk [vmem:[#allocation3 + $0x24] sm:$0xf] %vm507_vm3, %v500_v2  ;;  %v498_v55 = vpack.c.bf16 %v2643_v26, %v2643_v26  ;;  %v878_v4 = vsel %vm250_vm1, %v1912_v31, 0  ;;  %v534_v23 = vmul.f32 %v485_v40, %v485_v40 }
  0xd4   : > { %v2659_v59 = vpop.eup %2005  ;;  %v350_v33 = vmul.f32 %v2565_v0, %v349_v15  ;;  %v326_v27 = vmul.f32 %v2645_v56, %v2567_v29  ;;  %516 = vst.msk [vmem:[#allocation3 + $0x20] sm:$0xf] %vm507_vm3, %v499_v42  ;;  %vm341_vm14 = vweird.f32 %v2519_v9  ;;  %vm342_vm15 = vweird.f32 %v2596_v50  ;;  %884 = vmatpush.bf16.xpose.msra.mxu1 %v878_v4 }
  0xd5   : > { %v316_v61 = vmul.f32 %v2659_v59, %v2569_v17  ;;  %515 = vst.msk [vmem:[#allocation3 + $0x1c] sm:$0xf] %vm507_vm3, %v498_v55  ;;  %v384_v16 = vsel %vm2637_vm5, %v2477_v28, %v380_v37  ;;  %v340_v43 = vmul.f32 %v2596_v50, %v339_v13  ;;  %v374_v46 = vsel %vm2652_vm11, %v2525_v11, %v370_v48  ;;  %vm2707_vm0 = vmor %vm341_vm14, %vm342_vm15 }
  0xd6   : > { %v327_v20 = vmul.f32 %v2645_v56, %v326_v27  ;;  %v481_v32 = vmul.f32 %v384_v16, %v2256_v36  ;;  %v364_v39 = vsel %vm2665_vm12, %v2530_v19, %v360_v30  ;;  %v354_v28 = vsel %vm2679_vm13, %v2565_v0, %v350_v33 }
  0xd7   : > { %v317_v5 = vmul.f32 %v2659_v59, %v316_v61  ;;  %1813 = vmatpush.xpose.msk.msra.mxu0 %vm250_vm1, %v534_v23  ;;  %vm331_vm2 = vweird.f32 %v2567_v29  ;;  %v533_v22 = vmul.f32 %v484_v41, %v484_v41  ;;  %vm332_vm4 = vweird.f32 %v2645_v56  ;;  %v669_v29 = vpop.xlane.xlu1 %668  ;;  %v675_v23 = vpop.xlane.xlu0 %674 }
  0xd8   : > { %v328_v9 = vmul.f32 0.5, %v327_v20  ;;  %v497_v58 = vpack.c.bf16 %v481_v32, %v481_v32  ;;  %v480_v40 = vmul.f32 %v374_v46, %v2271_v45  ;;  %v479_v19 = vmul.f32 %v364_v39, %v2269_v44  ;;  %vm2726_vm6 = vmor %vm331_vm2, %vm332_vm4 }
  0xd9   : > { %v318_v36 = vmul.f32 0.5, %v317_v5  ;;  %v1911_v11 = vld [vmem:[#allocation3 + $0x28] sm:$0xff]  ;;  %vm321_vm9 = vweird.f32 %v2569_v17  ;;  %v478_v0 = vmul.f32 %v354_v28, %v2282_v52  ;;  %vm322_vm7 = vweird.f32 %v2659_v59 }
  0xda   : > { %v329_v47 = vsub.f32 1.5, %v328_v9  ;;  %514 = vst.msk [vmem:[#allocation3 + $0x18] sm:$0xf] %vm507_vm3, %v497_v58  ;;  %v496_v41 = vpack.c.bf16 %v480_v40, %v480_v40  ;;  %v344_v45 = vsel %vm2707_vm0, %v2596_v50, %v340_v43  ;;  %v875_v10 = vsel %vm250_vm1, %v1911_v11, 0  ;;  %vm2735_vm8 = vmor %vm321_vm9, %vm322_vm7 }
  0xdb   : > { %v319_v49 = vsub.f32 1.5, %v318_v36  ;;  %1814 = vmatpush.xpose.msk.msra.mxu0 %vm250_vm1, %v533_v22  ;;  %v532_v3 = vmul.f32 %v483_v18, %v483_v18  ;;  %v495_v15 = vpack.c.bf16 %v479_v19, %v479_v19  ;;  %v494_v25 = vpack.c.bf16 %v478_v0, %v478_v0  ;;  %v672_v18 = vpop.xlane.xlu2 %671  ;;  %v1910_v34 = vld [vmem:[#allocation3 + $0x20] sm:$0xff] }
  0xdc   : > { %v330_v38 = vmul.f32 %v2645_v56, %v329_v47  ;;  %885 = vmatpush.bf16.xpose.msra.mxu1 %v875_v10  ;;  %513 = vst.msk [vmem:[#allocation3 + $0x14] sm:$0xf] %vm507_vm3, %v496_v41  ;;  %v477_v51 = vmul.f32 %v344_v45, %v2284_v53  ;;  %v531_v17 = vmul.f32 %v2643_v26, %v2643_v26  ;;  %v2749_v35 = vmax.f32 %v669_v29, 1e-24 }
  0xdd   : > { %v320_v52 = vmul.f32 %v2659_v59, %v319_v49  ;;  %512 = vst.msk [vmem:[#allocation3 + $0x10] sm:$0xf] %vm507_vm3, %v495_v15  ;;  %v2755_v30 = vmax.f32 %v672_v18, 1e-24  ;;  %v872_v26 = vsel %vm250_vm1, %v1910_v34, 0  ;;  %v530_v42 = vmul.f32 %v481_v32, %v481_v32 }
  0xde   : > { %511 = vst.msk [vmem:[#allocation3 + $0xc] sm:$0xf] %vm507_vm3, %v494_v25  ;;  %v334_v57 = vsel %vm2726_vm6, %v2645_v56, %v330_v38  ;;  %v493_v2 = vpack.c.bf16 %v477_v51, %v477_v51  ;;  %v2112_v12 = vmov 1.0   ;;  %2007 = vrsqrt.f32 %v2749_v35 }
  0xdf   : > { %1815 = vmatpush.xpose.msk.msra.mxu0 %vm250_vm1, %v532_v3  ;;  %v476_v48 = vmul.f32 %v334_v57, %v2296_v60  ;;  %v324_v53 = vsel %vm2735_vm8, %v2659_v59, %v320_v52  ;;  %1922 = vmatpush.msra.mxu3 %v2112_v12  ;;  %2009 = vrsqrt.f32 %v2755_v30  ;;  %v528_v55 = vmul.f32 %v479_v19, %v479_v19  ;;  %v678_v1 = vpop.xlane.xlu1 %677 }
  0xe0   : > { %510 = vst.msk [vmem:[#allocation3 + $0x8] sm:$0xf] %vm507_vm3, %v493_v2  ;;  %v475_v31 = vmul.f32 %v324_v53, %v2286_v54  ;;  %v529_v54 = vmul.f32 %v480_v40, %v480_v40  ;;  %v527_v20 = vmul.f32 %v478_v0, %v478_v0  ;;  %v2783_v43 = vmax.f32 %v678_v1, 1e-24  ;;  %v684_v0 = vpop.xlane.xlu0 %683 }
  0xe1   : > { %v492_v56 = vpack.c.bf16 %v476_v48, %v476_v48  ;;  %1923 = vmatpush.msra.mxu3 %v2112_v12  ;;  %v1909_v59 = vld [vmem:[#allocation3 + $0x18] sm:$0xff]  ;;  %v2786_v5 = vmax.f32 %v675_v23, 1e-24  ;;  %v526_v39 = vmul.f32 %v477_v51, %v477_v51  ;;  %v525_v36 = vmul.f32 %v476_v48, %v476_v48 }
  0xe2   : > { %v491_v60 = vpack.c.bf16 %v475_v31, %v475_v31  ;;  %v869_v27 = vsel %vm250_vm1, %v1909_v59, 0  ;;  %2011 = vrsqrt.f32 %v2783_v43  ;;  %vm705_vm5 = vweird.f32 %v2749_v35 }
  0xe3   : > { %1816 = vmatpush.xpose.msk.msra.mxu0 %vm250_vm1, %v531_v17  ;;  %509 = vst.msk [vmem:[#allocation3 + $0x4] sm:$0xf] %vm507_vm3, %v492_v56  ;;  %1924 = vmatpush.msra.mxu3 %v2112_v12  ;;  %2013 = vrsqrt.f32 %v2786_v5  ;;  %v524_v49 = vmul.f32 %v475_v31, %v475_v31  ;;  %vm715_vm11 = vweird.f32 %v2755_v30  ;;  %v681_v3 = vpop.xlane.xlu2 %680  ;;  %v2823_v25 = vmax.f32 %v684_v0, 1e-24 }
  0xe4   : > { %886 = vmatpush.bf16.xpose.msra.mxu1 %v872_v26  ;;  %508 = vst.msk [vmem:[#allocation3] sm:$0xf] %vm507_vm3, %v491_v60  ;;  %v2770_v33 = vpop.eup %2007  ;;  %v1908_v16 = vld [vmem:[#allocation3 + $0x10] sm:$0xff]  ;;  %v2825_v50 = vmax.f32 %v681_v3, 1e-24  ;;  %vm735_vm15 = vweird.f32 %v2783_v43  ;;  %vm725_vm2 = vweird.f32 %v2786_v5  ;;  %v611_v15 = vlaneseq }
  0xe5   : > { %1925 = vmatpush.msra.mxu3 %v2112_v12  ;;  %v2772_v13 = vpop.eup %2009  ;;  %v700_v61 = vmul.f32 %v2770_v33, %v2749_v35  ;;  %v866_v46 = vsel %vm250_vm1, %v1908_v16, 0  ;;  %vm706_vm10 = vweird.f32 %v2770_v33  ;;  %2015 = vrsqrt.f32 %v2823_v25 }
  0xe6   : > { %v710_v4 = vmul.f32 %v2772_v13, %v2755_v30  ;;  %vm716_vm12 = vweird.f32 %v2772_v13  ;;  %vm2807_vm13 = vmor %vm705_vm5, %vm706_vm10  ;;  %2017 = vrsqrt.f32 %v2825_v50  ;;  %vm755_vm6 = vweird.f32 %v2823_v25 }
  0xe7   : > { %1817 = vmatpush.xpose.msk.msra.mxu0 %vm250_vm1, %v530_v42  ;;  %1926 = vmatpush.msra.mxu3 %v2112_v12  ;;  %v701_v32 = vmul.f32 %v2770_v33, %v700_v61  ;;  %v1907_v22 = vld [vmem:[#allocation3 + $0x8] sm:$0xff]  ;;  %vm2817_vm14 = vmor %vm715_vm11, %vm716_vm12  ;;  %v687_v42 = vpop.xlane.xlu1 %686  ;;  %vm745_vm5 = vweird.f32 %v2825_v50 }
  0xe8   : > { %v711_v9 = vmul.f32 %v2772_v13, %v710_v4  ;;  %v2796_v58 = vpop.eup %2011  ;;  %v863_v19 = vsel %vm250_vm1, %v1907_v22, 0 }
  0xe9   : > { %1927 = vmatpush.msra.mxu3 %v2112_v12  ;;  %v702_v28 = vmul.f32 0.5, %v701_v32  ;;  %v2798_v40 = vpop.eup %2013  ;;  %v730_v44 = vmul.f32 %v2796_v58, %v2783_v43  ;;  %vm736_vm0 = vweird.f32 %v2796_v58 }
  0xea   : > { %v712_v37 = vmul.f32 0.5, %v711_v9  ;;  %v720_v10 = vmul.f32 %v2798_v40, %v2786_v5  ;;  %vm726_vm4 = vweird.f32 %v2798_v40  ;;  %vm2853_vm9 = vmor %vm735_vm15, %vm736_vm0 }
  0xeb   : > { %1818 = vmatpush.xpose.msk.msra.mxu0 %vm250_vm1, %v529_v54  ;;  %1928 = vmatpush.msra.mxu3 %v2112_v12  ;;  %v703_v47 = vsub.f32 1.5, %v702_v28  ;;  %v1906_v52 = vld [vmem:[#allocation3] sm:$0xff]  ;;  %v731_v29 = vmul.f32 %v2796_v58, %v730_v44  ;;  %v2016_v30 = vpop.eup %2015  ;;  %vm727_vm7 = vmor %vm725_vm2, %vm726_vm4 }
  0xec   : > { %887 = vmatpush.bf16.xpose.msra.mxu1 %v869_v27  ;;  %v713_v11 = vsub.f32 1.5, %v712_v37  ;;  %v721_v51 = vmul.f32 %v2798_v40, %v720_v10  ;;  %v860_v17 = vsel %vm250_vm1, %v1906_v52, 0  ;;  %v2018_v26 = vpop.eup %2017  ;;  %v697_v27 = vmax.f32 %v687_v42, 1e-24 }
  0xed   : > { %1929 = vmatpush.msra.mxu3 %v2112_v12  ;;  %v704_v38 = vmul.f32 %v2770_v33, %v703_v47  ;;  %v732_v48 = vmul.f32 0.5, %v731_v29  ;;  %vm756_vm8 = vweird.f32 %v2016_v30  ;;  %vm746_vm10 = vweird.f32 %v2018_v26 }
  0xee   : > { %v714_v45 = vmul.f32 %v2772_v13, %v713_v11  ;;  %v722_v35 = vmul.f32 0.5, %v721_v51  ;;  %2019 = vrsqrt.f32 %v697_v27  ;;  %vm757_vm11 = vmor %vm755_vm6, %vm756_vm8  ;;  %v2883_v52 = vand.u32 127, %v611_v15 }
  0xef   : > { %1819 = vmatpush.xpose.msk.msra.mxu0 %vm250_vm1, %v528_v55  ;;  %v708_v18 = vsel %vm2807_vm13, %v2770_v33, %v704_v38  ;;  %v733_v56 = vsub.f32 1.5, %v732_v48  ;;  %v750_v33 = vmul.f32 %v2016_v30, %v2823_v25  ;;  %vm747_vm12 = vmor %vm745_vm5, %vm746_vm10  ;;  %vm765_vm13 = vweird.f32 %v697_v27 }
  0xf0   : > { %v718_v57 = vsel %vm2817_vm14, %v2772_v13, %v714_v45  ;;  %v779_v34 = vmul.f32 %v708_v18, %v2302_v62  ;;  %v723_v31 = vsub.f32 1.5, %v722_v35  ;;  %v740_v13 = vmul.f32 %v2018_v26, %v2825_v50 }
  0xf1   : > { %v780_v2 = vmul.f32 %v718_v57, %v2307_v63  ;;  %v734_v60 = vmul.f32 %v2796_v58, %v733_v56  ;;  %v751_v55 = vmul.f32 %v2016_v30, %v750_v33 }
  0xf2   : > { %v724_v59 = vmul.f32 %v2798_v40, %v723_v31  ;;  %v741_v1 = vmul.f32 %v2018_v26, %v740_v13 }
  0xf3   : > { %1820 = vmatpush.xpose.msk.msra.mxu0 %vm250_vm1, %v527_v20  ;;  %v787_v53 = vpack.c.bf16 %v780_v2, %v779_v34  ;;  %v738_v4 = vsel %vm2853_vm9, %v2796_v58, %v734_v60  ;;  %v752_v16 = vmul.f32 0.5, %v751_v55  ;;  %vm613_vm9 = vcmp.lt.s32.totalorder %v2883_v52, 20 }
  0xf4   : > { %888 = vmatpush.bf16.xpose.msra.mxu1 %v866_v46  ;;  %v728_v61 = vsel %vm727_vm7, %v2798_v40, %v724_v59  ;;  %v782_v20 = vmul.f32 %v738_v4, %v2321_v6  ;;  %v742_v43 = vmul.f32 0.5, %v741_v1  ;;  %v2020_v32 = vpop.eup %2019 }
  0xf5   : > { %v781_v23 = vmul.f32 %v728_v61, %v2326_v7  ;;  %v753_v9 = vsub.f32 1.5, %v752_v16  ;;  %v760_v28 = vmul.f32 %v2020_v32, %v697_v27  ;;  %vm766_vm14 = vweird.f32 %v2020_v32 }
  0xf6   : > { %v743_v46 = vsub.f32 1.5, %v742_v43  ;;  %vm767_vm2 = vmor %vm765_vm13, %vm766_vm14 }
  0xf7   : > { %1821 = vmatpush.xpose.msk.msra.mxu0 %vm250_vm1, %v526_v39  ;;  %v788_v5 = vpack.c.bf16 %v782_v20, %v781_v23 }
  0xfb   : > { %1822 = vmatpush.xpose.msk.msra.mxu0 %vm250_vm1, %v525_v36  ;;  %v761_v36 = vmul.f32 %v2020_v32, %v760_v28 }
  0xfc   : > { %889 = vmatpush.bf16.xpose.msra.mxu1 %v863_v19 }
  0xfd   : > { %v762_v19 = vmul.f32 0.5, %v761_v36 }
  0xff   : > { %1823 = vmatpush.xpose.msk.msra.mxu0 %vm250_vm1, %v524_v49  ;;  %v763_v38 = vsub.f32 1.5, %v762_v19 }
 0x102   : > { %1824 = vmatmul.msk.f32.vlgmr.msra.gmra.mxu0 %vm250_vm1, %v2112_v12 }
 0x103   : > { %1252 = vmatpush.msrb.mxu0 %v2358_v24 }
 0x104   : > { %890 = vmatpush.bf16.xpose.msra.mxu1 %v860_v17 }
 0x105   : > { %1253 = vmatpush.msrb.mxu0 %v2353_v21 }
 0x107   : > { %1254 = vmatpush.msrb.mxu0 %v2344_v14 }
 0x109   : > { %1255 = vmatpush.msrb.mxu0 %v2331_v8 }
 0x10b   : > { %1256 = vmatpush.msrb.mxu0 %v2321_v6  ;;  %1857 = vmatmul.msk.bf16.vlgmr.msra.gmra.mxu1 %vm250_vm1, %v787_v53  ;;  %v754_v6 = vmul.f32 %v2016_v30, %v753_v9 }
 0x10d   : > { %1257 = vmatpush.msrb.mxu0 %v2326_v7  ;;  %v744_v7 = vmul.f32 %v2018_v26, %v743_v46  ;;  %v758_v47 = vsel %vm757_vm11, %v2016_v30, %v754_v6 }
 0x10e   : > { %v784_v40 = vmul.f32 %v758_v47, %v2344_v14 }
 0x10f   : > { %1258 = vmatpush.msrb.mxu0 %v2307_v63  ;;  %v690_v63 = vpop.xlane.xlu2 %689  ;;  %v748_v58 = vsel %vm747_vm12, %v2018_v26, %v744_v7 }
 0x110   : > { %v783_v11 = vmul.f32 %v748_v58, %v2331_v8 }
 0x111   : > { %1259 = vmatpush.msrb.mxu0 %v2302_v62  ;;  %v698_v62 = vmax.f32 %v690_v63, 1e-24 }
 0x112   : > { %v789_v0 = vpack.c.bf16 %v784_v40, %v783_v11 }
 0x113   : > { %1365 = vmatpush.msra.mxu0 %v2112_v12  ;;  %2021 = vrsqrt.f32 %v698_v62  ;;  %vm775_vm15 = vweird.f32 %v698_v62 }
 0x115   : > { %1366 = vmatpush.msra.mxu0 %v2112_v12 }
 0x117   : > { %1367 = vmatpush.msra.mxu0 %v2112_v12 }
 0x119   : > { %1368 = vmatpush.msra.mxu0 %v2112_v12  ;;  %v2022_v39 = vpop.eup %2021 }
 0x11a   : > { %v770_v37 = vmul.f32 %v2022_v39, %v698_v62  ;;  %vm776_vm0 = vweird.f32 %v2022_v39 }
 0x11b   : > { %1369 = vmatpush.msra.mxu0 %v2112_v12  ;;  %1858 = vmatmul.msk.bf16.gmra.mxu1 %vm250_vm1, %v788_v5  ;;  %vm777_vm4 = vmor %vm775_vm15, %vm776_vm0 }
 0x11c   : > { %v771_v22 = vmul.f32 %v2022_v39, %v770_v37 }
 0x11d   : > { %1370 = vmatpush.msra.mxu0 %v2112_v12 }
 0x11e   : > { %v772_v49 = vmul.f32 0.5, %v771_v22 }
 0x11f   : > { %1371 = vmatpush.msra.mxu0 %v2112_v12 }
 0x120   : > { %v773_v41 = vsub.f32 1.5, %v772_v49 }
 0x121   : > { %1372 = vmatpush.msra.mxu0 %v2112_v12  ;;  %v764_v12 = vmul.f32 %v2020_v32, %v763_v38 }
 0x122   : > { %v774_v45 = vmul.f32 %v2022_v39, %v773_v41 }
 0x123   : > { %v768_v44 = vsel %vm767_vm2, %v2020_v32, %v764_v12 }
 0x124   : > { %v778_v10 = vsel %vm777_vm4, %v2022_v39, %v774_v45  ;;  %v785_v8 = vmul.f32 %v768_v44, %v2353_v21 }
 0x125   : > { %v786_v14 = vmul.f32 %v778_v10, %v2358_v24 }
 0x127   : > { %v790_v3 = vpack.c.bf16 %v786_v14, %v785_v8 }
 0x12b   : > { %1859 = vmatmul.msk.bf16.gmra.mxu1 %vm250_vm1, %v789_v0 }
 0x13b   : > { %1860 = vmatmul.msk.bf16.gmra.mxu1 %vm250_vm1, %v790_v3 }
 0x17f   : > { %v608_v25 = vpop.f32.mrf.mxu0 }
 0x180   : > { %v614_v50 = vmul.f32 0.5, %v608_v25 }
 0x182   : > { %v615_v29 = vsel %vm613_vm9, %v614_v50, 1e+30 }
 0x183   : > { %616 = vst [vmem:[#allocation4] sm:$0x1] %v615_v29 }
 0x188   : > { %v892_v51 = vpop.f32.mrf.mxu1 }
 0x18a   : > { %v1974_v18 = vld [vmem:[#allocation4] ss:$0 sm:$0xff] }
 0x18b   : > { %v916_v57 = vsub.f32 %v892_v51, %v1974_v18 }
 0x18d   : > { %924 = vmax.xlane.f32.xlu0 %v916_v57 }
 0x190   : > { %v894_v17 = vpop.f32.mrf.mxu1 }
 0x191   : > { %v917_v21 = vsub.f32 %v894_v17, %v1974_v18 }
 0x193   : > { %926 = vmax.xlane.f32.xlu1 %v917_v21 }
 0x198   : > { %v897_v24 = vpop.f32.mrf.mxu1 }
 0x199   : > { %v918_v34 = vsub.f32 %v897_v24, %v1974_v18 }
 0x19b   : > { %928 = vmax.xlane.f32.xlu2 %v918_v34 }
 0x1a0   : > { %v899_v2 = vpop.f32.mrf.mxu1 }
 0x1a1   : > { %v919_v48 = vsub.f32 %v899_v2, %v1974_v18 }
 0x1a3   : > { %930 = vmax.xlane.f32.xlu0 %v919_v48 }
 0x1a8   : > { %v902_v35 = vpop.f32.mrf.mxu1 }
 0x1a9   : > { %v920_v53 = vsub.f32 %v902_v35, %v1974_v18 }
 0x1ab   : > { %932 = vmax.xlane.f32.xlu1 %v920_v53 }
 0x1b0   : > { %v904_v30 = vpop.f32.mrf.mxu1 }
 0x1b1   : > { %v921_v56 = vsub.f32 %v904_v30, %v1974_v18 }
 0x1b3   : > { %934 = vmax.xlane.f32.xlu2 %v921_v56 }
 0x1b8   : > { %v907_v31 = vpop.f32.mrf.mxu1 }
 0x1b9   : > { %v922_v26 = vsub.f32 %v907_v31, %v1974_v18 }
 0x1bb   : > { %936 = vmax.xlane.f32.xlu0 %v922_v26 }
 0x1c0   : > { %v909_v42 = vpop.f32.mrf.mxu1 }
 0x1c1   : > { %v923_v60 = vsub.f32 %v909_v42, %v1974_v18 }
 0x1c3   : > { %938 = vmax.xlane.f32.xlu1 %v923_v60 }
 0x200   : > { %v925_v54 = vpop.xlane.xlu0 %924 }
 0x201   : > { %vm942_vm7 = vcmp.eq.f32.partialorder %v916_v57, %v925_v54 }
 0x202   : > { %v950_v59 = vsel %vm942_vm7, %v2883_v52, 128 }
 0x203   : > { %v959_v33 = vshra.s32 %v950_v59, 16  ;;  %v958_v0 = vand.u32 65535, %v950_v59  ;;  %v2113_v59 = vmov 0.0  }
 0x204   : > { %617 = vst.msk [vmem:[#allocation5] sm:$0xff] %vm250_vm1, %v2113_v59 }
 0x205   : > { %v961_v13 = vcvt.s32.f32 %v959_v33  ;;  %v960_v41 = vcvt.s32.f32 %v958_v0  ;;  %618 = vst.msk [vmem:[#allocation5 + $0x8] sm:$0xff] %vm250_vm1, %v2113_v59 }
 0x206   : > { %v927_v63 = vpop.xlane.xlu1 %926  ;;  %619 = vst.msk [vmem:[#allocation5 + $0x10] sm:$0xff] %vm250_vm1, %v2113_v59 }
 0x207   : > { %962 = vmin.xlane.f32.xlu2 %v961_v13  ;;  %vm943_vm6 = vcmp.eq.f32.partialorder %v917_v21, %v927_v63  ;;  %620 = vst.msk [vmem:[#allocation5 + $0x18] sm:$0xff] %vm250_vm1, %v2113_v59 }
 0x208   : > { %v951_v27 = vsel %vm943_vm6, %v2883_v52, 128  ;;  %621 = vst.msk [vmem:[#allocation5 + $0x20] sm:$0xff] %vm250_vm1, %v2113_v59 }
 0x209   : > { %v973_v62 = vshra.s32 %v951_v27, 16  ;;  %v972_v45 = vand.u32 65535, %v951_v27  ;;  %622 = vst.msk [vmem:[#allocation5 + $0x28] sm:$0xff] %vm250_vm1, %v2113_v59 }
 0x20a   : > { %623 = vst.msk [vmem:[#allocation5 + $0x30] sm:$0xff] %vm250_vm1, %v2113_v59 }
 0x20b   : > { %v975_v55 = vcvt.s32.f32 %v973_v62  ;;  %v974_v10 = vcvt.s32.f32 %v972_v45  ;;  %624 = vst.msk [vmem:[#allocation5 + $0x38] sm:$0xff] %vm250_vm1, %v2113_v59 }
 0x20c   : > { %625 = vst.msk [vmem:[#allocation5 + $0x40] sm:$0xff] %vm250_vm1, %v2113_v59 }
 0x20d   : > { %976 = vmin.xlane.f32.xlu0 %v975_v55  ;;  %626 = vst.msk [vmem:[#allocation5 + $0x48] sm:$0xff] %vm250_vm1, %v2113_v59 }
 0x20e   : > { %v929_v1 = vpop.xlane.xlu2 %928  ;;  %627 = vst.msk [vmem:[#allocation5 + $0x50] sm:$0xff] %vm250_vm1, %v2113_v59 }
 0x20f   : > { %vm944_vm8 = vcmp.eq.f32.partialorder %v918_v34, %v929_v1  ;;  %628 = vst.msk [vmem:[#allocation5 + $0x58] sm:$0xff] %vm250_vm1, %v2113_v59 }
 0x210   : > { %v952_v61 = vsel %vm944_vm8, %v2883_v52, 128  ;;  %629 = vst.msk [vmem:[#allocation5 + $0x60] sm:$0xff] %vm250_vm1, %v2113_v59  ;;  %vm633_vm8 = vcmask 7168  }
 0x211   : > { %v987_v4 = vshra.s32 %v952_v61, 16  ;;  %v986_v14 = vand.u32 65535, %v952_v61  ;;  %630 = vst.msk [vmem:[#allocation5 + $0x68] sm:$0xff] %vm250_vm1, %v2113_v59 }
 0x212   : > { %631 = vst.msk [vmem:[#allocation5 + $0x70] sm:$0xff] %vm250_vm1, %v2113_v59 }
 0x213   : > { %v989_v23 = vcvt.s32.f32 %v987_v4  ;;  %v988_v15 = vcvt.s32.f32 %v986_v14  ;;  %632 = vst.msk [vmem:[#allocation5 + $0x78] sm:$0xff] %vm250_vm1, %v2113_v59 }
 0x214   : > { %634 = vst.msk [vmem:[#allocation6] sm:$0xff] %vm633_vm8, %v2113_v59 }
 0x215   : > { %990 = vmin.xlane.f32.xlu1 %v989_v23  ;;  %635 = vst.msk [vmem:[#allocation6 + $0x8] sm:$0xff] %vm633_vm8, %v2113_v59 }
 0x216   : > { %v931_v20 = vpop.xlane.xlu0 %930  ;;  %636 = vst.msk [vmem:[#allocation6 + $0x10] sm:$0xff] %vm633_vm8, %v2113_v59 }
 0x217   : > { %vm945_vm5 = vcmp.eq.f32.partialorder %v919_v48, %v931_v20  ;;  %637 = vst.msk [vmem:[#allocation6 + $0x18] sm:$0xff] %vm633_vm8, %v2113_v59 }
 0x218   : > { %v953_v16 = vsel %vm945_vm5, %v2883_v52, 128  ;;  %638 = vst.msk [vmem:[#allocation6 + $0x20] sm:$0xff] %vm633_vm8, %v2113_v59 }
 0x219   : > { %v1001_v43 = vshra.s32 %v953_v16, 16  ;;  %v1000_v50 = vand.u32 65535, %v953_v16  ;;  %639 = vst.msk [vmem:[#allocation6 + $0x28] sm:$0xff] %vm633_vm8, %v2113_v59 }
 0x21a   : > { %640 = vst.msk [vmem:[#allocation6 + $0x30] sm:$0xff] %vm633_vm8, %v2113_v59 }
 0x21b   : > { %v1003_v5 = vcvt.s32.f32 %v1001_v43  ;;  %v1002_v51 = vcvt.s32.f32 %v1000_v50  ;;  %641 = vst.msk [vmem:[#allocation6 + $0x38] sm:$0xff] %vm633_vm8, %v2113_v59 }
 0x21c   : > { %642 = vst.msk [vmem:[#allocation6 + $0x40] sm:$0xff] %vm633_vm8, %v2113_v59 }
 0x21d   : > { %1004 = vmin.xlane.f32.xlu2 %v1003_v5  ;;  %643 = vst.msk [vmem:[#allocation6 + $0x48] sm:$0xff] %vm633_vm8, %v2113_v59 }
 0x21e   : > { %v933_v32 = vpop.xlane.xlu1 %932  ;;  %644 = vst.msk [vmem:[#allocation6 + $0x50] sm:$0xff] %vm633_vm8, %v2113_v59 }
 0x21f   : > { %vm946_vm10 = vcmp.eq.f32.partialorder %v920_v53, %v933_v32  ;;  %645 = vst.msk [vmem:[#allocation6 + $0x58] sm:$0xff] %vm633_vm8, %v2113_v59 }
 0x220   : > { %v954_v9 = vsel %vm946_vm10, %v2883_v52, 128  ;;  %646 = vst.msk [vmem:[#allocation6 + $0x60] sm:$0xff] %vm633_vm8, %v2113_v59 }
 0x221   : > { %v1015_v46 = vshra.s32 %v954_v9, 16  ;;  %v1014_v57 = vand.u32 65535, %v954_v9  ;;  %647 = vst.msk [vmem:[#allocation6 + $0x68] sm:$0xff] %vm633_vm8, %v2113_v59 }
 0x222   : > { %648 = vst.msk [vmem:[#allocation6 + $0x70] sm:$0xff] %vm633_vm8, %v2113_v59 }
 0x223   : > { %v1017_v39 = vcvt.s32.f32 %v1015_v46  ;;  %v1016_v21 = vcvt.s32.f32 %v1014_v57  ;;  %649 = vst.msk [vmem:[#allocation6 + $0x78] sm:$0xff] %vm633_vm8, %v2113_v59 }
 0x225   : > { %1018 = vmin.xlane.f32.xlu0 %v1017_v39 }
 0x226   : > { %v935_v6 = vpop.xlane.xlu2 %934 }
 0x227   : > { %vm947_vm11 = vcmp.eq.f32.partialorder %v921_v56, %v935_v6 }
 0x228   : > { %v955_v7 = vsel %vm947_vm11, %v2883_v52, 128 }
 0x229   : > { %v1029_v28 = vshra.s32 %v955_v7, 16  ;;  %v1028_v34 = vand.u32 65535, %v955_v7 }
 0x22b   : > { %v1031_v37 = vcvt.s32.f32 %v1029_v28  ;;  %v1030_v48 = vcvt.s32.f32 %v1028_v34 }
 0x22d   : > { %1032 = vmin.xlane.f32.xlu1 %v1031_v37 }
 0x22e   : > { %v937_v36 = vpop.xlane.xlu0 %936 }
 0x22f   : > { %vm948_vm12 = vcmp.eq.f32.partialorder %v922_v26, %v937_v36 }
 0x230   : > { %v956_v22 = vsel %vm948_vm12, %v2883_v52, 128 }
 0x231   : > { %v1043_v58 = vshra.s32 %v956_v22, 16  ;;  %v1042_v53 = vand.u32 65535, %v956_v22 }
 0x233   : > { %v1045_v47 = vcvt.s32.f32 %v1043_v58  ;;  %v1044_v56 = vcvt.s32.f32 %v1042_v53 }
 0x235   : > { %1046 = vmin.xlane.f32.xlu2 %v1045_v47 }
 0x236   : > { %v939_v11 = vpop.xlane.xlu1 %938 }
 0x237   : > { %vm949_vm13 = vcmp.eq.f32.partialorder %v923_v60, %v939_v11 }
 0x238   : > { %v957_v40 = vsel %vm949_vm13, %v2883_v52, 128 }
 0x239   : > { %v1057_v19 = vshra.s32 %v957_v40, 16  ;;  %v1056_v26 = vand.u32 65535, %v957_v40 }
 0x23b   : > { %v1059_v49 = vcvt.s32.f32 %v1057_v19  ;;  %v1058_v60 = vcvt.s32.f32 %v1056_v26 }
 0x23d   : > { %1060 = vmin.xlane.f32.xlu0 %v1059_v49 }
 0x27a   : > { %v2894_v38 = vpop.xlane.xlu2 %962 }
 0x27b   : > { %vm964_vm14 = vcmp.eq.f32.partialorder %v961_v13, %v2894_v38  ;;  %v969_v33 = vcvt.f32.s32 %v2894_v38 }
 0x27c   : > { %v965_v12 = vsel %vm964_vm14, %v960_v41, inf }
 0x27d   : > { %966 = vmin.xlane.f32.xlu1 %v965_v12  ;;  %v970_v63 = vshll.u32 %v969_v33, 16  ;;  %v1147_v33 = vld [vmem:[#allocation5] sm:$0xff] }
 0x280   : > { %v2897_v44 = vpop.xlane.xlu0 %976 }
 0x281   : > { %vm978_vm15 = vcmp.eq.f32.partialorder %v975_v55, %v2897_v44  ;;  %v983_v55 = vcvt.f32.s32 %v2897_v44 }
 0x282   : > { %v979_v8 = vsel %vm978_vm15, %v974_v10, inf }
 0x283   : > { %980 = vmin.xlane.f32.xlu2 %v979_v8  ;;  %v984_v4 = vshll.u32 %v983_v55, 16 }
 0x288   : > { %v2900_v3 = vpop.xlane.xlu1 %990 }
 0x289   : > { %vm992_vm0 = vcmp.eq.f32.partialorder %v989_v23, %v2900_v3  ;;  %v997_v16 = vcvt.f32.s32 %v2900_v3 }
 0x28a   : > { %v993_v25 = vsel %vm992_vm0, %v988_v15, inf }
 0x28b   : > { %994 = vmin.xlane.f32.xlu0 %v993_v25  ;;  %v998_v32 = vshll.u32 %v997_v16, 16  ;;  %v1343_v16 = vld [vmem:[#allocation6 + $0x10] sm:$0xff] }
 0x290   : > { %v2903_v29 = vpop.xlane.xlu2 %1004 }
 0x291   : > { %vm1006_vm2 = vcmp.eq.f32.partialorder %v1003_v5, %v2903_v29 }
 0x292   : > { %v1007_v18 = vsel %vm1006_vm2, %v1002_v51, inf  ;;  %vm1195_vm2 = vcmask 523264  }
 0x293   : > { %1008 = vmin.xlane.f32.xlu1 %v1007_v18 }
 0x298   : > { %v2906_v17 = vpop.xlane.xlu0 %1018 }
 0x299   : > { %vm1020_vm4 = vcmp.eq.f32.partialorder %v1017_v39, %v2906_v17  ;;  %v1011_v39 = vcvt.f32.s32 %v2903_v29  ;;  %v1025_v22 = vcvt.f32.s32 %v2906_v17 }
 0x29a   : > { %v1021_v24 = vsel %vm1020_vm4, %v1016_v21, inf }
 0x29b   : > { %1022 = vmin.xlane.f32.xlu2 %v1021_v24  ;;  %v1012_v28 = vshll.u32 %v1011_v39, 16  ;;  %v1026_v11 = vshll.u32 %v1025_v22, 16 }
 0x2a0   : > { %v2909_v2 = vpop.xlane.xlu1 %1032 }
 0x2a1   : > { %vm1034_vm9 = vcmp.eq.f32.partialorder %v1031_v37, %v2909_v2 }
 0x2a2   : > { %v1035_v35 = vsel %vm1034_vm9, %v1030_v48, inf }
 0x2a3   : > { %1036 = vmin.xlane.f32.xlu0 %v1035_v35 }
 0x2a8   : > { %v2912_v30 = vpop.xlane.xlu2 %1046 }
 0x2a9   : > { %vm1048_vm7 = vcmp.eq.f32.partialorder %v1045_v47, %v2912_v30  ;;  %v1053_v44 = vcvt.f32.s32 %v2912_v30 }
 0x2aa   : > { %v1049_v31 = vsel %vm1048_vm7, %v1044_v56, inf }
 0x2ab   : > { %1050 = vmin.xlane.f32.xlu1 %v1049_v31  ;;  %v1054_v14 = vshll.u32 %v1053_v44, 16 }
 0x2b0   : > { %v2915_v42 = vpop.xlane.xlu0 %1060 }
 0x2b1   : > { %vm1062_vm6 = vcmp.eq.f32.partialorder %v1059_v49, %v2915_v42  ;;  %v1039_v49 = vcvt.f32.s32 %v2909_v2  ;;  %v1067_v25 = vcvt.f32.s32 %v2915_v42 }
 0x2b2   : > { %v1063_v54 = vsel %vm1062_vm6, %v1058_v60, inf }
 0x2b3   : > { %1064 = vmin.xlane.f32.xlu2 %v1063_v54  ;;  %v1040_v41 = vshll.u32 %v1039_v49, 16  ;;  %v1068_v51 = vshll.u32 %v1067_v25, 16  ;;  %v1152_v25 = vld [vmem:[#allocation5 + $0x28] sm:$0xff] }
 0x2f0   : > { %v967_v13 = vpop.xlane.xlu1 %966 }
 0x2f1   : > { %v968_v27 = vcvt.f32.s32 %v967_v13 }
 0x2f3   : > { %v971_v62 = vadd.s32 %v970_v63, %v968_v27  ;;  %v2114_v27 = vmov 0  }
 0x2f4   : > { %1971 = vset.pattern.permute.xlu1 %v2114_v27  ;;  %1972 = vset.pattern.permute.xlu2 %v2114_v27 }
 0x2f5   : > { %1073 = vst.msk [vmem:[%s3154_s3] sm:$0xff] %vm633_vm8, %v971_v62  ;;  %vm1081_vm5 = vcmp.eq.s32.totalorder %v2883_v52, %v971_v62  ;;  %v1148_v62 = vld [vmem:[#allocation5 + $0x8] sm:$0xff] }
 0x2f6   : > { %v1861_v1 = vsel %vm1081_vm5, 1.0, %v2113_v59  ;;  %v981_v61 = vpop.xlane.xlu2 %980 }
 0x2f7   : > { %1163 = vxpose.xlu0.b32.start [1/8] (short) %v1861_v1, 128  ;;  %v982_v23 = vcvt.f32.s32 %v981_v61  ;;  %v1341_v61 = vld [vmem:[#allocation6] sm:$0xff] }
 0x2f9   : > { %v985_v20 = vadd.s32 %v984_v4, %v982_v23 }
 0x2fb   : > { %1074 = vst.msk [vmem:[%s3154_s3 + $0x8] sm:$0xff] %vm633_vm8, %v985_v20  ;;  %vm1082_vm10 = vcmp.eq.s32.totalorder %v2883_v52, %v985_v20  ;;  %v1149_v20 = vld [vmem:[#allocation5 + $0x10] sm:$0xff] }
 0x2fc   : > { %v1862_v43 = vsel %vm1082_vm10, 1.0, %v2113_v59 }
 0x2fe   : > { %v995_v5 = vpop.xlane.xlu0 %994 }
 0x2ff   : > { %1164 = vxpose.xlu0.b32.cont [2/8] (short) %v1862_v43, 128  ;;  %v996_v9 = vcvt.f32.s32 %v995_v5  ;;  %v1342_v5 = vld [vmem:[#allocation6 + $0x8] sm:$0xff] }
 0x301   : > { %v999_v46 = vadd.s32 %v998_v32, %v996_v9 }
 0x303   : > { %1075 = vst.msk [vmem:[%s3154_s3 + $0x10] sm:$0xff] %vm633_vm8, %v999_v46  ;;  %vm1083_vm11 = vcmp.eq.s32.totalorder %v2883_v52, %v999_v46 }
 0x304   : > { %v1863_v6 = vsel %vm1083_vm11, 1.0, %v2113_v59 }
 0x306   : > { %v1009_v7 = vpop.xlane.xlu1 %1008 }
 0x307   : > { %1165 = vxpose.xlu0.b32.cont [3/8] (short) %v1863_v6, 128  ;;  %v1010_v37 = vcvt.f32.s32 %v1009_v7 }
 0x309   : > { %v1013_v36 = vadd.s32 %v1012_v28, %v1010_v37  ;;  %v1150_v37 = vld [vmem:[#allocation5 + $0x18] sm:$0xff] }
 0x30b   : > { %1076 = vst.msk [vmem:[%s3154_s3 + $0x18] sm:$0xff] %vm633_vm8, %v1013_v36  ;;  %vm1084_vm12 = vcmp.eq.s32.totalorder %v2883_v52, %v1013_v36  ;;  %v1344_v36 = vld [vmem:[#allocation6 + $0x18] sm:$0xff] }
 0x30c   : > { %v1864_v58 = vsel %vm1084_vm12, 1.0, %v2113_v59 }
 0x30e   : > { %v1023_v47 = vpop.xlane.xlu2 %1022 }
 0x30f   : > { %1166 = vxpose.xlu0.b32.cont [4/8] (short) %v1864_v58, 128  ;;  %v1024_v40 = vcvt.f32.s32 %v1023_v47 }
 0x311   : > { %v1027_v19 = vadd.s32 %v1026_v11, %v1024_v40 }
 0x313   : > { %1077 = vst.msk [vmem:[%s3154_s3 + $0x20] sm:$0xff] %vm633_vm8, %v1027_v19  ;;  %vm1085_vm13 = vcmp.eq.s32.totalorder %v2883_v52, %v1027_v19 }
 0x314   : > { %v1865_v0 = vsel %vm1085_vm13, 1.0, %v2113_v59 }
 0x316   : > { %v1037_v38 = vpop.xlane.xlu0 %1036 }
 0x317   : > { %1167 = vxpose.xlu0.b32.cont [5/8] (short) %v1865_v0, 128  ;;  %v1038_v12 = vcvt.f32.s32 %v1037_v38  ;;  %v1151_v0 = vld [vmem:[#allocation5 + $0x20] sm:$0xff] }
 0x319   : > { %v1041_v45 = vadd.s32 %v1040_v41, %v1038_v12  ;;  %v1345_v41 = vld [vmem:[#allocation6 + $0x20] sm:$0xff] }
 0x31b   : > { %1078 = vst.msk [vmem:[%s3154_s3 + $0x28] sm:$0xff] %vm633_vm8, %v1041_v45  ;;  %vm1086_vm14 = vcmp.eq.s32.totalorder %v2883_v52, %v1041_v45 }
 0x31c   : > { %v1866_v10 = vsel %vm1086_vm14, 1.0, %v2113_v59 }
 0x31e   : > { %v1051_v8 = vpop.xlane.xlu1 %1050 }
 0x31f   : > { %1168 = vxpose.xlu0.b32.cont [6/8] (short) %v1866_v10, 128  ;;  %v1052_v3 = vcvt.f32.s32 %v1051_v8 }
 0x321   : > { %v1055_v15 = vadd.s32 %v1054_v14, %v1052_v3 }
 0x323   : > { %1079 = vst.msk [vmem:[%s3154_s3 + $0x30] sm:$0xff] %vm633_vm8, %v1055_v15  ;;  %vm1087_vm15 = vcmp.eq.s32.totalorder %v2883_v52, %v1055_v15 }
 0x324   : > { %v1867_v50 = vsel %vm1087_vm15, 1.0, %v2113_v59 }
 0x326   : > { %v1065_v29 = vpop.xlane.xlu2 %1064 }
 0x327   : > { %1169 = vxpose.xlu0.b32.cont [7/8] (short) %v1867_v50, 128  ;;  %v1066_v18 = vcvt.f32.s32 %v1065_v29  ;;  %v1346_v50 = vld [vmem:[#allocation6 + $0x28] sm:$0xff] }
 0x329   : > { %v1069_v57 = vadd.s32 %v1068_v51, %v1066_v18 }
 0x32b   : > { %1080 = vst.msk [vmem:[%s3154_s3 + $0x38] sm:$0xff] %vm633_vm8, %v1069_v57  ;;  %vm1088_vm0 = vcmp.eq.s32.totalorder %v2883_v52, %v1069_v57 }
 0x32c   : > { %v1868_v17 = vsel %vm1088_vm0, 1.0, %v2113_v59 }
 0x32f   : > { %1170 = vxpose.xlu0.b32.end [8/8] (short) %v1868_v17, 128 }
 0x396   : > { %1973 = vset.pattern.permute.xlu0 %v2114_v27 }
 0x39b   : > { %v1179_v21 = vpop.trf.xlu0 }
 0x39c   : > { %1869 = vmatmul.msk.f32.vlgmr.msrb.gmra.mxu0 %vm1195_vm2, %v1179_v21 }
 0x3a3   : > { %v1180_v24 = vpop.trf.xlu0 }
 0x3a4   : > { %1870 = vmatmul.msk.f32.gmra.mxu0 %vm1195_vm2, %v1180_v24 }
 0x3ab   : > { %v1181_v34 = vpop.trf.xlu0 }
 0x3ac   : > { %1871 = vmatmul.msk.f32.vlgmr.msra.gmra.mxu2 %vm1195_vm2, %v1181_v34  ;;  %1885 = vmatmul.msk.f32.vlgmr.msra.gmra.mxu0 %vm1195_vm2, %v1179_v21 }
 0x3ad   : > { %1887 = vmatmul.msk.f32.vlgmr.msra.gmra.mxu3 %vm1195_vm2, %v1181_v34 }
 0x3b3   : > { %v1182_v2 = vpop.trf.xlu0 }
 0x3b4   : > { %1872 = vmatmul.msk.f32.gmra.mxu2 %vm1195_vm2, %v1182_v2  ;;  %1886 = vmatmul.msk.f32.gmra.mxu0 %vm1195_vm2, %v1180_v24 }
 0x3b5   : > { %1888 = vmatmul.msk.f32.gmra.mxu3 %vm1195_vm2, %v1182_v2  ;;  %v1153_v2 = vld [vmem:[#allocation5 + $0x30] sm:$0xff] }
 0x3bb   : > { %v1183_v52 = vpop.trf.xlu0 }
 0x3bc   : > { %1873 = vmatmul.msk.f32.gmra.mxu2 %vm1195_vm2, %v1183_v52 }
 0x3bd   : > { %1889 = vmatmul.msk.f32.gmra.mxu3 %vm1195_vm2, %v1183_v52  ;;  %v1347_v52 = vld [vmem:[#allocation6 + $0x30] sm:$0xff] }
 0x3c3   : > { %v1184_v48 = vpop.trf.xlu0 }
 0x3c4   : > { %1874 = vmatmul.msk.f32.gmra.mxu2 %vm1195_vm2, %v1184_v48 }
 0x3c5   : > { %1890 = vmatmul.msk.f32.gmra.mxu3 %vm1195_vm2, %v1184_v48 }
 0x3cb   : > { %v1185_v35 = vpop.trf.xlu0 }
 0x3cc   : > { %1875 = vmatmul.msk.f32.gmra.mxu2 %vm1195_vm2, %v1185_v35 }
 0x3cd   : > { %1891 = vmatmul.msk.f32.gmra.mxu3 %vm1195_vm2, %v1185_v35 }
 0x3d3   : > { %v1186_v53 = vpop.trf.xlu0 }
 0x3d4   : > { %1876 = vmatmul.msk.f32.gmra.mxu2 %vm1195_vm2, %v1186_v53 }
 0x3d5   : > { %1892 = vmatmul.msk.f32.gmra.mxu3 %vm1195_vm2, %v1186_v53 }
 0x3db   : > { %v1187_v30 = vpop.trf.xlu0 }
 0x3dc   : > { %1877 = vmatmul.msk.f32.gmra.mxu2 %vm1195_vm2, %v1187_v30 }
 0x3dd   : > { %1893 = vmatmul.msk.f32.gmra.mxu3 %vm1195_vm2, %v1187_v30 }
 0x3e3   : > { %v1188_v56 = vpop.trf.xlu0 }
 0x3e4   : > { %1878 = vmatmul.msk.f32.gmra.mxu2 %vm1195_vm2, %v1188_v56 }
 0x3e5   : > { %1894 = vmatmul.msk.f32.gmra.mxu3 %vm1195_vm2, %v1188_v56 }
 0x3eb   : > { %v1189_v31 = vpop.trf.xlu0 }
 0x3ec   : > { %1879 = vmatmul.msk.f32.gmra.mxu2 %vm1195_vm2, %v1189_v31 }
 0x3ed   : > { %1895 = vmatmul.msk.f32.gmra.mxu3 %vm1195_vm2, %v1189_v31 }
 0x3f3   : > { %v1190_v26 = vpop.trf.xlu0 }
 0x3f4   : > { %1880 = vmatmul.msk.f32.gmra.mxu2 %vm1195_vm2, %v1190_v26 }
 0x3f5   : > { %1896 = vmatmul.msk.f32.gmra.mxu3 %vm1195_vm2, %v1190_v26 }
 0x3fb   : > { %v1191_v42 = vpop.trf.xlu0 }
 0x3fc   : > { %1881 = vmatmul.msk.f32.gmra.mxu2 %vm1195_vm2, %v1191_v42 }
 0x3fd   : > { %1897 = vmatmul.msk.f32.gmra.mxu3 %vm1195_vm2, %v1191_v42  ;;  %v1154_v42 = vld [vmem:[#allocation5 + $0x38] sm:$0xff] }
 0x403   : > { %v1192_v60 = vpop.trf.xlu0 }
 0x404   : > { %1882 = vmatmul.msk.f32.gmra.mxu2 %vm1195_vm2, %v1192_v60 }
 0x405   : > { %1898 = vmatmul.msk.f32.gmra.mxu3 %vm1195_vm2, %v1192_v60  ;;  %v1348_v60 = vld [vmem:[#allocation6 + $0x38] sm:$0xff] }
 0x40b   : > { %v1193_v54 = vpop.trf.xlu0 }
 0x40c   : > { %1883 = vmatmul.msk.f32.gmra.mxu2 %vm1195_vm2, %v1193_v54 }
 0x40d   : > { %1899 = vmatmul.msk.f32.gmra.mxu3 %vm1195_vm2, %v1193_v54 }
 0x413   : > { %v1194_v59 = vpop.trf.xlu0 }
 0x414   : > { %1884 = vmatmul.msk.f32.gmra.mxu2 %vm1195_vm2, %v1194_v59 }
 0x415   : > { %1900 = vmatmul.msk.f32.gmra.mxu3 %vm1195_vm2, %v1194_v59 }
 0x419   : > { %v1261_v13 = vpop.f32.mrf.mxu0 }
 0x41a   : > { %v1309_v63 = vadd.f32 %v1261_v13, %v1147_v33 }
 0x41c   : > { %1325 = vst.msk [vmem:[#allocation5] sm:$0xff] %vm250_vm1, %v1309_v63 }
 0x421   : > { %v1264_v55 = vpop.f32.mrf.mxu0 }
 0x422   : > { %v1310_v1 = vadd.f32 %v1264_v55, %v1148_v62  ;;  %v1155_v55 = vld [vmem:[#allocation5 + $0x40] sm:$0xff] }
 0x424   : > { %1326 = vst.msk [vmem:[#allocation5 + $0x8] sm:$0xff] %vm250_vm1, %v1310_v1  ;;  %v1349_v1 = vld [vmem:[#allocation6 + $0x40] sm:$0xff] }
 0x429   : > { %v1374_v4 = vpop.f32.mrf.mxu0 }
 0x42a   : > { %v1422_v23 = vadd.f32 %v1374_v4, %v1341_v61 }
 0x42c   : > { %1438 = vst.msk [vmem:[#allocation6] sm:$0xff] %vm633_vm8, %v1422_v23 }
 0x42f   : > { %v1267_v43 = vpop.f32.mrf.mxu2 }
 0x430   : > { %v1311_v32 = vadd.f32 %v1267_v43, %v1149_v20  ;;  %v1380_v9 = vpop.f32.mrf.mxu3 }
 0x431   : > { %v1424_v46 = vadd.f32 %v1380_v9, %v1343_v16  ;;  %v1377_v39 = vpop.f32.mrf.mxu0  ;;  %v1350_v9 = vld [vmem:[#allocation6 + $0x48] sm:$0xff] }
 0x432   : > { %1327 = vst.msk [vmem:[#allocation5 + $0x10] sm:$0xff] %vm250_vm1, %v1311_v32  ;;  %v1423_v6 = vadd.f32 %v1377_v39, %v1342_v5  ;;  %v1156_v32 = vld [vmem:[#allocation5 + $0x48] sm:$0xff] }
 0x433   : > { %1440 = vst.msk [vmem:[#allocation6 + $0x10] sm:$0xff] %vm633_vm8, %v1424_v46  ;;  %v1473_v7 = vld [vmem:[#allocation6] sm:$0xff] }
 0x434   : > { %1439 = vst.msk [vmem:[#allocation6 + $0x8] sm:$0xff] %vm633_vm8, %v1423_v6  ;;  %v1489_v28 = vadd.f32 1e-06, %v1473_v7 }
 0x436   : > { %2023 = vrcp.f32 %v1489_v28 }
 0x437   : > { %v1270_v22 = vpop.f32.mrf.mxu2 }
 0x438   : > { %v1312_v58 = vadd.f32 %v1270_v22, %v1150_v37  ;;  %v1383_v47 = vpop.f32.mrf.mxu3  ;;  %v1157_v22 = vld [vmem:[#allocation5 + $0x50] sm:$0xff] }
 0x439   : > { %v1425_v11 = vadd.f32 %v1383_v47, %v1344_v36 }
 0x43a   : > { %1328 = vst.msk [vmem:[#allocation5 + $0x18] sm:$0xff] %vm250_vm1, %v1312_v58  ;;  %v1475_v40 = vld [vmem:[#allocation6 + $0x10] sm:$0xff] }
 0x43b   : > { %1441 = vst.msk [vmem:[#allocation6 + $0x18] sm:$0xff] %vm633_vm8, %v1425_v11  ;;  %v1491_v19 = vadd.f32 1e-06, %v1475_v40  ;;  %v1474_v38 = vld [vmem:[#allocation6 + $0x8] sm:$0xff]  ;;  %v1351_v58 = vld [vmem:[#allocation6 + $0x50] sm:$0xff] }
 0x43c   : > { %v2024_v49 = vpop.eup %2023  ;;  %v1490_v10 = vadd.f32 1e-06, %v1474_v38 }
 0x43d   : > { %1539 = vperm.xlu1 %1971, %v2024_v49   ;;  %2025 = vrcp.f32 %v1491_v19 }
 0x43e   : > { %2027 = vrcp.f32 %v1490_v10 }
 0x43f   : > { %v1273_v12 = vpop.f32.mrf.mxu2 }
 0x440   : > { %v1313_v45 = vadd.f32 %v1273_v12, %v1151_v0  ;;  %v1386_v44 = vpop.f32.mrf.mxu3  ;;  %v1352_v12 = vld [vmem:[#allocation6 + $0x58] sm:$0xff] }
 0x441   : > { %v1426_v8 = vadd.f32 %v1386_v44, %v1345_v41  ;;  %v1158_v41 = vld [vmem:[#allocation5 + $0x58] sm:$0xff] }
 0x442   : > { %1329 = vst.msk [vmem:[#allocation5 + $0x20] sm:$0xff] %vm250_vm1, %v1313_v45  ;;  %v1476_v14 = vld [vmem:[#allocation6 + $0x18] sm:$0xff] }
 0x443   : > { %v2026_v3 = vpop.eup %2025  ;;  %1442 = vst.msk [vmem:[#allocation6 + $0x20] sm:$0xff] %vm633_vm8, %v1426_v8  ;;  %v1492_v15 = vadd.f32 1e-06, %v1476_v14 }
 0x444   : > { %1549 = vperm.xlu2 %1972, %v2026_v3   ;;  %v2028_v17 = vpop.eup %2027 }
 0x445   : > { %2029 = vrcp.f32 %v1492_v15 }
 0x447   : > { %v1276_v29 = vpop.f32.mrf.mxu2 }
 0x448   : > { %v1314_v51 = vadd.f32 %v1276_v29, %v1152_v25  ;;  %v1389_v18 = vpop.f32.mrf.mxu3  ;;  %v1159_v25 = vld [vmem:[#allocation5 + $0x60] sm:$0xff] }
 0x449   : > { %v1427_v57 = vadd.f32 %v1389_v18, %v1346_v50  ;;  %v1353_v50 = vld [vmem:[#allocation6 + $0x60] sm:$0xff] }
 0x44a   : > { %1330 = vst.msk [vmem:[#allocation5 + $0x28] sm:$0xff] %vm250_vm1, %v1314_v51  ;;  %v1477_v21 = vld [vmem:[#allocation6 + $0x20] sm:$0xff] }
 0x44b   : > { %v2030_v24 = vpop.eup %2029  ;;  %1443 = vst.msk [vmem:[#allocation6 + $0x28] sm:$0xff] %vm633_vm8, %v1427_v57  ;;  %v1493_v34 = vadd.f32 1e-06, %v1477_v21 }
 0x44c   : > { %1544 = vperm.xlu2 %1972, %v2028_v17   ;;  %1554 = vperm.xlu1 %1971, %v2030_v24  }
 0x44d   : > { %2031 = vrcp.f32 %v1493_v34  ;;  %v1160_v34 = vld [vmem:[#allocation5 + $0x68] sm:$0xff] }
 0x44f   : > { %v1279_v48 = vpop.f32.mrf.mxu2 }
 0x450   : > { %v1315_v35 = vadd.f32 %v1279_v48, %v1153_v2  ;;  %v1392_v53 = vpop.f32.mrf.mxu3  ;;  %v1354_v2 = vld [vmem:[#allocation6 + $0x68] sm:$0xff] }
 0x451   : > { %v1428_v30 = vadd.f32 %v1392_v53, %v1347_v52 }
 0x452   : > { %1331 = vst.msk [vmem:[#allocation5 + $0x30] sm:$0xff] %vm250_vm1, %v1315_v35  ;;  %v1478_v56 = vld [vmem:[#allocation6 + $0x28] sm:$0xff] }
 0x453   : > { %v2032_v31 = vpop.eup %2031  ;;  %1444 = vst.msk [vmem:[#allocation6 + $0x30] sm:$0xff] %vm633_vm8, %v1428_v30  ;;  %v1494_v26 = vadd.f32 1e-06, %v1478_v56 }
 0x454   : > { %1559 = vperm.xlu2 %1972, %v2032_v31  }
 0x455   : > { %2033 = vrcp.f32 %v1494_v26  ;;  %v1161_v26 = vld [vmem:[#allocation5 + $0x70] sm:$0xff] }
 0x457   : > { %v1282_v54 = vpop.f32.mrf.mxu2 }
 0x458   : > { %v1316_v59 = vadd.f32 %v1282_v54, %v1154_v42  ;;  %v1395_v33 = vpop.f32.mrf.mxu3  ;;  %v1355_v42 = vld [vmem:[#allocation6 + $0x70] sm:$0xff] }
 0x459   : > { %v1429_v13 = vadd.f32 %v1395_v33, %v1348_v60 }
 0x45a   : > { %1332 = vst.msk [vmem:[#allocation5 + $0x38] sm:$0xff] %vm250_vm1, %v1316_v59  ;;  %v1479_v63 = vld [vmem:[#allocation6 + $0x30] sm:$0xff] }
 0x45b   : > { %v2034_v27 = vpop.eup %2033  ;;  %1445 = vst.msk [vmem:[#allocation6 + $0x38] sm:$0xff] %vm633_vm8, %v1429_v13  ;;  %v1495_v62 = vadd.f32 1e-06, %v1479_v63 }
 0x45c   : > { %1564 = vperm.xlu1 %1971, %v2034_v27  }
 0x45d   : > { %2035 = vrcp.f32 %v1495_v62  ;;  %v1162_v62 = vld [vmem:[#allocation5 + $0x78] sm:$0xff] }
 0x45f   : > { %v1285_v61 = vpop.f32.mrf.mxu2 }
 0x460   : > { %v1317_v4 = vadd.f32 %v1285_v61, %v1155_v55  ;;  %v1398_v23 = vpop.f32.mrf.mxu3  ;;  %v1356_v55 = vld [vmem:[#allocation6 + $0x78] sm:$0xff] }
 0x461   : > { %v1430_v20 = vadd.f32 %v1398_v23, %v1349_v1 }
 0x462   : > { %1333 = vst.msk [vmem:[#allocation5 + $0x40] sm:$0xff] %vm250_vm1, %v1317_v4  ;;  %v1480_v16 = vld [vmem:[#allocation6 + $0x38] sm:$0xff] }
 0x463   : > { %v2036_v43 = vpop.eup %2035  ;;  %1446 = vst.msk [vmem:[#allocation6 + $0x40] sm:$0xff] %vm633_vm8, %v1430_v20  ;;  %v1496_v5 = vadd.f32 1e-06, %v1480_v16 }
 0x464   : > { %1569 = vperm.xlu2 %1972, %v2036_v43  }
 0x465   : > { %2037 = vrcp.f32 %v1496_v5  ;;  %v1459_v5 = vld [vmem:[#allocation2 + $0x10] sm:$0xff] }
 0x467   : > { %v1288_v46 = vpop.f32.mrf.mxu2 }
 0x468   : > { %v1318_v39 = vadd.f32 %v1288_v46, %v1156_v32  ;;  %v1401_v6 = vpop.f32.mrf.mxu3 }
 0x469   : > { %v1431_v7 = vadd.f32 %v1401_v6, %v1350_v9  ;;  %v1523_v9 = vld [vmem:[#allocation5 + $0x10] sm:$0xff] }
 0x46a   : > { %1334 = vst.msk [vmem:[#allocation5 + $0x48] sm:$0xff] %vm250_vm1, %v1318_v39  ;;  %v1481_v28 = vld [vmem:[#allocation6 + $0x40] sm:$0xff] }
 0x46b   : > { %v2038_v37 = vpop.eup %2037  ;;  %1447 = vst.msk [vmem:[#allocation6 + $0x48] sm:$0xff] %vm633_vm8, %v1431_v7  ;;  %v1497_v36 = vadd.f32 1e-06, %v1481_v28 }
 0x46c   : > { %1574 = vperm.xlu1 %1971, %v2038_v37   ;;  %v1458_v37 = vld [vmem:[#allocation2 + $0x8] sm:$0xff] }
 0x46d   : > { %2039 = vrcp.f32 %v1497_v36  ;;  %v1522_v36 = vld [vmem:[#allocation5 + $0x8] sm:$0xff] }
 0x46f   : > { %v1291_v47 = vpop.f32.mrf.mxu2 }
 0x470   : > { %v1319_v11 = vadd.f32 %v1291_v47, %v1157_v22  ;;  %v1404_v40 = vpop.f32.mrf.mxu3 }
 0x471   : > { %v1432_v19 = vadd.f32 %v1404_v40, %v1351_v58  ;;  %v1461_v40 = vld [vmem:[#allocation2 + $0x20] sm:$0xff] }
 0x472   : > { %1335 = vst.msk [vmem:[#allocation5 + $0x50] sm:$0xff] %vm250_vm1, %v1319_v11  ;;  %v1482_v49 = vld [vmem:[#allocation6 + $0x48] sm:$0xff] }
 0x473   : > { %v2040_v0 = vpop.eup %2039  ;;  %1448 = vst.msk [vmem:[#allocation6 + $0x50] sm:$0xff] %vm633_vm8, %v1432_v19  ;;  %v1498_v38 = vadd.f32 1e-06, %v1482_v49  ;;  %v1525_v49 = vld [vmem:[#allocation5 + $0x20] sm:$0xff] }
 0x474   : > { %1579 = vperm.xlu2 %1972, %v2040_v0  }
 0x475   : > { %2041 = vrcp.f32 %v1498_v38  ;;  %v1457_v38 = vld [vmem:[#allocation2] sm:$0xff] }
 0x477   : > { %v1294_v45 = vpop.f32.mrf.mxu2 }
 0x478   : > { %v1320_v44 = vadd.f32 %v1294_v45, %v1158_v41  ;;  %v1407_v10 = vpop.f32.mrf.mxu3  ;;  %v1521_v41 = vld [vmem:[#allocation5] sm:$0xff] }
 0x479   : > { %v1433_v8 = vadd.f32 %v1407_v10, %v1352_v12 }
 0x47a   : > { %1336 = vst.msk [vmem:[#allocation5 + $0x58] sm:$0xff] %vm250_vm1, %v1320_v44  ;;  %v1483_v14 = vld [vmem:[#allocation6 + $0x50] sm:$0xff] }
 0x47b   : > { %v2042_v3 = vpop.eup %2041  ;;  %1449 = vst.msk [vmem:[#allocation6 + $0x58] sm:$0xff] %vm633_vm8, %v1433_v8  ;;  %v1499_v15 = vadd.f32 1e-06, %v1483_v14 }
 0x47c   : > { %1584 = vperm.xlu1 %1971, %v2042_v3  }
 0x47d   : > { %2043 = vrcp.f32 %v1499_v15 }
 0x47f   : > { %v1297_v29 = vpop.f32.mrf.mxu2 }
 0x480   : > { %v1321_v51 = vadd.f32 %v1297_v29, %v1159_v25  ;;  %v1410_v18 = vpop.f32.mrf.mxu3 }
 0x481   : > { %v1434_v57 = vadd.f32 %v1410_v18, %v1353_v50  ;;  %v1524_v18 = vld [vmem:[#allocation5 + $0x18] sm:$0xff] }
 0x482   : > { %1337 = vst.msk [vmem:[#allocation5 + $0x60] sm:$0xff] %vm250_vm1, %v1321_v51  ;;  %v1484_v17 = vld [vmem:[#allocation6 + $0x58] sm:$0xff] }
 0x483   : > { %v2044_v21 = vpop.eup %2043  ;;  %1450 = vst.msk [vmem:[#allocation6 + $0x60] sm:$0xff] %vm633_vm8, %v1434_v57  ;;  %v1500_v24 = vadd.f32 1e-06, %v1484_v17  ;;  %v1460_v57 = vld [vmem:[#allocation2 + $0x18] sm:$0xff] }
 0x484   : > { %1589 = vperm.xlu2 %1972, %v2044_v21   ;;  %v1463_v21 = vld [vmem:[#allocation2 + $0x30] sm:$0xff] }
 0x485   : > { %2045 = vrcp.f32 %v1500_v24 }
 0x487   : > { %v1300_v52 = vpop.f32.mrf.mxu2 }
 0x488   : > { %v1322_v48 = vadd.f32 %v1300_v52, %v1160_v34  ;;  %v1413_v35 = vpop.f32.mrf.mxu3  ;;  %v1527_v34 = vld [vmem:[#allocation5 + $0x30] sm:$0xff] }
 0x489   : > { %v1435_v53 = vadd.f32 %v1413_v35, %v1354_v2 }
 0x48a   : > { %1338 = vst.msk [vmem:[#allocation5 + $0x68] sm:$0xff] %vm250_vm1, %v1322_v48  ;;  %v1485_v30 = vld [vmem:[#allocation6 + $0x60] sm:$0xff] }
 0x48b   : > { %v2046_v56 = vpop.eup %2045  ;;  %1451 = vst.msk [vmem:[#allocation6 + $0x68] sm:$0xff] %vm633_vm8, %v1435_v53  ;;  %v1501_v31 = vadd.f32 1e-06, %v1485_v30 }
 0x48c   : > { %1594 = vperm.xlu1 %1971, %v2046_v56  }
 0x48d   : > { %2047 = vrcp.f32 %v1501_v31 }
 0x48f   : > { %v1303_v60 = vpop.f32.mrf.mxu2 }
 0x490   : > { %v1323_v54 = vadd.f32 %v1303_v60, %v1161_v26  ;;  %v1416_v59 = vpop.f32.mrf.mxu3  ;;  %v1526_v60 = vld [vmem:[#allocation5 + $0x28] sm:$0xff] }
 0x491   : > { %v1436_v33 = vadd.f32 %v1416_v59, %v1355_v42 }
 0x492   : > { %1339 = vst.msk [vmem:[#allocation5 + $0x70] sm:$0xff] %vm250_vm1, %v1323_v54  ;;  %v1486_v13 = vld [vmem:[#allocation6 + $0x68] sm:$0xff] }
 0x493   : > { %v2048_v63 = vpop.eup %2047  ;;  %1452 = vst.msk [vmem:[#allocation6 + $0x70] sm:$0xff] %vm633_vm8, %v1436_v33  ;;  %v1502_v27 = vadd.f32 1e-06, %v1486_v13  ;;  %v1462_v54 = vld [vmem:[#allocation2 + $0x28] sm:$0xff]  ;;  %v1465_v33 = vld [vmem:[#allocation2 + $0x40] sm:$0xff] }
 0x494   : > { %1599 = vperm.xlu2 %1972, %v2048_v63   ;;  %v1529_v63 = vld [vmem:[#allocation5 + $0x40] sm:$0xff] }
 0x495   : > { %2049 = vrcp.f32 %v1502_v27 }
 0x497   : > { %v1306_v1 = vpop.f32.mrf.mxu2 }
 0x498   : > { %v1324_v61 = vadd.f32 %v1306_v1, %v1162_v62  ;;  %v1419_v4 = vpop.f32.mrf.mxu3 }
 0x499   : > { %v1437_v23 = vadd.f32 %v1419_v4, %v1356_v55 }
 0x49a   : > { %1340 = vst.msk [vmem:[#allocation5 + $0x78] sm:$0xff] %vm250_vm1, %v1324_v61  ;;  %v1487_v20 = vld [vmem:[#allocation6 + $0x70] sm:$0xff] }
 0x49b   : > { %v2050_v16 = vpop.eup %2049  ;;  %1453 = vst.msk [vmem:[#allocation6 + $0x78] sm:$0xff] %vm633_vm8, %v1437_v23  ;;  %v1503_v43 = vadd.f32 1e-06, %v1487_v20 }
 0x49c   : > { %1604 = vperm.xlu1 %1971, %v2050_v16  }
 0x49d   : > { %2051 = vrcp.f32 %v1503_v43 }
 0x49e   : > { %v1550_v32 = vpop.permute.xlu2 %1549 }
 0x49f   : > { %v1619_v46 = vmul.f32 %v1550_v32, %v1523_v9  ;;  %v1528_v9 = vld [vmem:[#allocation5 + $0x38] sm:$0xff] }
 0x4a1   : > { %v1635_v39 = vsub.f32 %v1619_v46, %v1459_v5  ;;  %1708 = vst.msk [vmem:[#allocation2 + $0x10] sm:$0xff] %vm250_vm1, %v1619_v46  ;;  %v1464_v5 = vld [vmem:[#allocation2 + $0x38] sm:$0xff] }
 0x4a2   : > { %1725 = vst.msk [vmem:[#allocation8 + $0x10] sm:$0xf] %vm507_vm3, %v1619_v46  ;;  %v1488_v6 = vld [vmem:[#allocation6 + $0x78] sm:$0xff] }
 0x4a3   : > { %v2052_v7 = vpop.eup %2051  ;;  %v1504_v28 = vadd.f32 1e-06, %v1488_v6  ;;  %v1651_v14 = vmul.f32 %v1635_v39, %v1635_v39  ;;  %v1531_v39 = vld [vmem:[#allocation5 + $0x50] sm:$0xff] }
 0x4a4   : > { %1609 = vperm.xlu2 %1972, %v2052_v7   ;;  %v1467_v7 = vld [vmem:[#allocation2 + $0x50] sm:$0xff] }
 0x4a5   : > { %2053 = vrcp.f32 %v1504_v28  ;;  %v1668_v29 = vsel %vm250_vm1, %v1651_v14, 0.0  ;;  %v1532_v14 = vld [vmem:[#allocation5 + $0x58] sm:$0xff] }
 0x4a6   : > { %v1545_v22 = vpop.permute.xlu2 %1544 }
 0x4a7   : > { %v1618_v58 = vmul.f32 %v1545_v22, %v1522_v36 }
 0x4a9   : > { %v1634_v47 = vsub.f32 %v1618_v58, %v1458_v37  ;;  %1707 = vst.msk [vmem:[#allocation2 + $0x8] sm:$0xff] %vm250_vm1, %v1618_v58 }
 0x4aa   : > { %1723 = vst.msk [vmem:[#allocation8 + $0x8] sm:$0xff] %vm250_vm1, %v1618_v58 }
 0x4ab   : > { %v2054_v11 = vpop.eup %2053  ;;  %v1650_v10 = vmul.f32 %v1634_v47, %v1634_v47 }
 0x4ac   : > { %1614 = vperm.xlu1 %1971, %v2054_v11  }
 0x4ad   : > { %v1666_v15 = vsel %vm250_vm1, %v1650_v10, 0.0  ;;  %v1468_v10 = vld [vmem:[#allocation2 + $0x58] sm:$0xff] }
 0x4ae   : > { %v1560_v19 = vpop.permute.xlu2 %1559 }
 0x4af   : > { %v1621_v0 = vmul.f32 %v1560_v19, %v1525_v49  ;;  %v1540_v12 = vpop.permute.xlu1 %1539  ;;  %v1466_v19 = vld [vmem:[#allocation2 + $0x48] sm:$0xff] }
 0x4b0   : > { %v1617_v45 = vmul.f32 %v1540_v12, %v1521_v41  ;;  %v1533_v41 = vld [vmem:[#allocation5 + $0x60] sm:$0xff] }
 0x4b1   : > { %v1637_v44 = vsub.f32 %v1621_v0, %v1461_v40  ;;  %1710 = vst.msk [vmem:[#allocation2 + $0x20] sm:$0xff] %vm250_vm1, %v1621_v0  ;;  %v1530_v0 = vld [vmem:[#allocation5 + $0x48] sm:$0xff] }
 0x4b2   : > { %v1633_v8 = vsub.f32 %v1617_v45, %v1457_v38  ;;  %1706 = vst.msk [vmem:[#allocation2] sm:$0xff] %vm250_vm1, %v1617_v45 }
 0x4b3   : > { %1722 = vst.msk [vmem:[#allocation8] sm:$0xff] %vm250_vm1, %v1617_v45  ;;  %v1653_v53 = vmul.f32 %v1637_v44, %v1637_v44  ;;  %v1469_v45 = vld [vmem:[#allocation2 + $0x60] sm:$0xff] }
 0x4b4   : > { %v1649_v3 = vmul.f32 %v1633_v8, %v1633_v8 }
 0x4b5   : > { %v1672_v26 = vsel %vm250_vm1, %v1653_v53, 0.0 }
 0x4b6   : > { %v1665_v25 = vsel %vm250_vm1, %v1649_v3, 0.0 }
 0x4b7   : > { %v1667_v50 = vadd.f32 %v1666_v15, %v1665_v25  ;;  %v1535_v15 = vld [vmem:[#allocation5 + $0x70] sm:$0xff] }
 0x4b9   : > { %v1669_v51 = vadd.f32 %v1668_v29, %v1667_v50  ;;  %v1471_v50 = vld [vmem:[#allocation2 + $0x70] sm:$0xff] }
 0x4be   : > { %v1555_v17 = vpop.permute.xlu1 %1554  ;;  %v1570_v24 = vpop.permute.xlu2 %1569 }
 0x4bf   : > { %v1620_v2 = vmul.f32 %v1555_v17, %v1524_v18  ;;  %v1623_v52 = vmul.f32 %v1570_v24, %v1527_v34 }
 0x4c1   : > { %v1636_v48 = vsub.f32 %v1620_v2, %v1460_v57  ;;  %1709 = vst.msk [vmem:[#allocation2 + $0x18] sm:$0xff] %vm250_vm1, %v1620_v2  ;;  %v1639_v35 = vsub.f32 %v1623_v52, %v1463_v21  ;;  %v1470_v57 = vld [vmem:[#allocation2 + $0x68] sm:$0xff] }
 0x4c2   : > { %1712 = vst.msk [vmem:[#allocation2 + $0x30] sm:$0xff] %vm250_vm1, %v1623_v52  ;;  %v1534_v21 = vld [vmem:[#allocation5 + $0x68] sm:$0xff] }
 0x4c3   : > { %v1652_v30 = vmul.f32 %v1636_v48, %v1636_v48  ;;  %v1655_v61 = vmul.f32 %v1639_v35, %v1639_v35 }
 0x4c5   : > { %v1670_v56 = vsel %vm250_vm1, %v1652_v30, 0.0  ;;  %v1676_v16 = vsel %vm250_vm1, %v1655_v61, 0.0 }
 0x4c6   : > { %v1671_v31 = vadd.f32 %v1670_v56, %v1669_v51 }
 0x4c8   : > { %v1673_v42 = vadd.f32 %v1672_v26, %v1671_v31 }
 0x4ce   : > { %v1565_v59 = vpop.permute.xlu1 %1564  ;;  %v1580_v13 = vpop.permute.xlu2 %1579 }
 0x4cf   : > { %v1622_v27 = vmul.f32 %v1565_v59, %v1526_v60  ;;  %v1625_v62 = vmul.f32 %v1580_v13, %v1529_v63 }
 0x4d1   : > { %v1638_v55 = vsub.f32 %v1622_v27, %v1462_v54  ;;  %1711 = vst.msk [vmem:[#allocation2 + $0x28] sm:$0xff] %vm250_vm1, %v1622_v27  ;;  %v1641_v1 = vsub.f32 %v1625_v62, %v1465_v33  ;;  %v1472_v27 = vld [vmem:[#allocation2 + $0x78] sm:$0xff] }
 0x4d2   : > { %1714 = vst.msk [vmem:[#allocation2 + $0x40] sm:$0xff] %vm250_vm1, %v1625_v62 }
 0x4d3   : > { %v1654_v4 = vmul.f32 %v1638_v55, %v1638_v55  ;;  %v1657_v36 = vmul.f32 %v1641_v1, %v1641_v1  ;;  %v1536_v55 = vld [vmem:[#allocation5 + $0x78] sm:$0xff] }
 0x4d5   : > { %v1674_v23 = vsel %vm250_vm1, %v1654_v4, 0.0  ;;  %v1680_v11 = vsel %vm250_vm1, %v1657_v36, 0.0 }
 0x4d6   : > { %v1675_v20 = vadd.f32 %v1674_v23, %v1673_v42 }
 0x4d8   : > { %v1677_v43 = vadd.f32 %v1676_v16, %v1675_v20 }
 0x4de   : > { %v1575_v32 = vpop.permute.xlu1 %1574  ;;  %v1590_v46 = vpop.permute.xlu2 %1589 }
 0x4df   : > { %v1624_v6 = vmul.f32 %v1575_v32, %v1528_v9  ;;  %v1627_v28 = vmul.f32 %v1590_v46, %v1531_v39 }
 0x4e1   : > { %v1640_v37 = vsub.f32 %v1624_v6, %v1464_v5  ;;  %1713 = vst.msk [vmem:[#allocation2 + $0x38] sm:$0xff] %vm250_vm1, %v1624_v6  ;;  %v1643_v24 = vsub.f32 %v1627_v28, %v1467_v7 }
 0x4e2   : > { %1716 = vst.msk [vmem:[#allocation2 + $0x50] sm:$0xff] %vm250_vm1, %v1627_v28 }
 0x4e3   : > { %v1656_v22 = vmul.f32 %v1640_v37, %v1640_v37  ;;  %v1659_v48 = vmul.f32 %v1643_v24, %v1643_v24 }
 0x4e5   : > { %v1678_v58 = vsel %vm250_vm1, %v1656_v22, 0.0  ;;  %v1684_v31 = vsel %vm250_vm1, %v1659_v48, 0.0 }
 0x4e6   : > { %v1679_v47 = vadd.f32 %v1678_v58, %v1677_v43 }
 0x4e8   : > { %v1681_v40 = vadd.f32 %v1680_v11, %v1679_v47 }
 0x4ee   : > { %v1585_v49 = vpop.permute.xlu1 %1584  ;;  %v1600_v38 = vpop.permute.xlu2 %1599 }
 0x4ef   : > { %v1626_v12 = vmul.f32 %v1585_v49, %v1530_v0  ;;  %v1629_v44 = vmul.f32 %v1600_v38, %v1533_v41 }
 0x4f1   : > { %1715 = vst.msk [vmem:[#allocation2 + $0x48] sm:$0xff] %vm250_vm1, %v1626_v12  ;;  %v1642_v51 = vsub.f32 %v1626_v12, %v1466_v19  ;;  %v1645_v30 = vsub.f32 %v1629_v44, %v1469_v45 }
 0x4f2   : > { %1718 = vst.msk [vmem:[#allocation2 + $0x60] sm:$0xff] %vm250_vm1, %v1629_v44 }
 0x4f3   : > { %v1658_v18 = vmul.f32 %v1642_v51, %v1642_v51  ;;  %v1661_v60 = vmul.f32 %v1645_v30, %v1645_v30 }
 0x4f5   : > { %v1682_v52 = vsel %vm250_vm1, %v1658_v18, 0.0  ;;  %v1688_v13 = vsel %vm250_vm1, %v1661_v60, 0.0 }
 0x4f6   : > { %v1683_v53 = vadd.f32 %v1682_v52, %v1681_v40 }
 0x4f8   : > { %v1685_v42 = vadd.f32 %v1684_v31, %v1683_v53 }
 0x4fe   : > { %v1595_v8 = vpop.permute.xlu1 %1594  ;;  %v1610_v3 = vpop.permute.xlu2 %1609 }
 0x4ff   : > { %v1628_v25 = vmul.f32 %v1595_v8, %v1532_v14  ;;  %v1631_v29 = vmul.f32 %v1610_v3, %v1535_v15 }
 0x501   : > { %1717 = vst.msk [vmem:[#allocation2 + $0x58] sm:$0xff] %vm250_vm1, %v1628_v25  ;;  %v1644_v34 = vsub.f32 %v1628_v25, %v1468_v10  ;;  %v1647_v33 = vsub.f32 %v1631_v29, %v1471_v50 }
 0x502   : > { %1720 = vst.msk [vmem:[#allocation2 + $0x70] sm:$0xff] %vm250_vm1, %v1631_v29 }
 0x503   : > { %v1660_v35 = vmul.f32 %v1644_v34, %v1644_v34  ;;  %v1663_v61 = vmul.f32 %v1647_v33, %v1647_v33 }
 0x505   : > { %v1686_v26 = vsel %vm250_vm1, %v1660_v35, 0.0  ;;  %v1692_v43 = vsel %vm250_vm1, %v1663_v61, 0.0 }
 0x506   : > { %v1687_v59 = vadd.f32 %v1686_v26, %v1685_v42 }
 0x508   : > { %v1689_v1 = vadd.f32 %v1688_v13, %v1687_v59 }
 0x50e   : > { %v1605_v17 = vpop.permute.xlu1 %1604 }
 0x50f   : > { %v1630_v2 = vmul.f32 %v1605_v17, %v1534_v21 }
 0x511   : > { %1719 = vst.msk [vmem:[#allocation2 + $0x68] sm:$0xff] %vm250_vm1, %v1630_v2  ;;  %v1646_v56 = vsub.f32 %v1630_v2, %v1470_v57 }
 0x513   : > { %v1662_v54 = vmul.f32 %v1646_v56, %v1646_v56 }
 0x515   : > { %v1690_v63 = vsel %vm250_vm1, %v1662_v54, 0.0 }
 0x516   : > { %v1691_v23 = vadd.f32 %v1690_v63, %v1689_v1 }
 0x518   : > { %v1693_v5 = vadd.f32 %v1692_v43, %v1691_v23 }
 0x51e   : > { %v1615_v62 = vpop.permute.xlu1 %1614 }
 0x51f   : > { %v1632_v4 = vmul.f32 %v1615_v62, %v1536_v55 }
 0x521   : > { %v1648_v20 = vsub.f32 %v1632_v4, %v1472_v27  ;;  %1721 = vst.msk [vmem:[#allocation2 + $0x78] sm:$0xff] %vm250_vm1, %v1632_v4 }
 0x523   : > { %v1664_v16 = vmul.f32 %v1648_v20, %v1648_v20 }
 0x525   : > { %v1694_v32 = vsel %vm250_vm1, %v1664_v16, 0.0 }
 0x526   : > { %v1695_v9 = vadd.f32 %v1694_v32, %v1693_v5 }
 0x528   : > { %1696 = vadd.xlane.f32.xlu2 %v1695_v9 }
 0x59b   : > { %v1697_v46 = vpop.xlane.xlu2 %1696 }
 0x59c   : > { %v1698_v39 = vrot.slane %v1697_v46, 4 }
 0x59e   : > { %v1699_v6 = vadd.f32 %v1698_v39, %v1697_v46 }
 0x5a0   : > { %v1700_v7 = vrot.slane %v1699_v6, 2 }
 0x5a2   : > { %v1701_v28 = vadd.f32 %v1700_v7, %v1699_v6 }
 0x5a4   : > { %v1702_v37 = vrot.slane %v1701_v28, 1 }
 0x5a6   : > { %v1703_v36 = vadd.f32 %v1702_v37, %v1701_v28 }
 0x5a8   : > { %1930 = vpush %v1703_v36 }
 0x5d9   : > { %s1931_s10 = spop %1930 }
 0x5da   : > { %s1705_s11 = smul.f32 0.0015625, %s1931_s10 }
 0x5dc   : > { %p1726_p6 = scmp.lt.f32.partialorder %s1705_s11, 1e-05 }
 0x5de   : > { %1932 = sst [smem:[#allocation7]] (%p1726_p6), %s2115_s12 }
 0x5df PF: > { %p1937_p7 = scmp.eq.s32.totalorder %s1802_s15, 99  ;;  %s1739_s19 = sshll.u32 %s3153_s2, 4  ;;  %s1740_s19 = int_to_ptr.hbm [resolvable:$true] %s1739_s19 }
 0x5e0   : > { %s2116_s20 = smov [#allocation8]   ;;  %s2117_s22 = smov 128  }
 0x5e1   : > { %s1737_s21 = sshll.u32 %s2116_s20, 4  ;;  %s2118_s23 = smov 8   ;;  %s1738_s21 = int_to_ptr.vmem [resolvable:$true] %s1737_s21 }
 0x5e2   : > { %1934 = dma.vmem_to_hbm [thread:$0]  (%p1937_p7), %s1738_s21, 384, %s1740_s19, [#allocation9], %s2117_s22, %s2117_s22, %s2118_s23  }
 0x5e3   : > { %2096 = dma.done.wait (%p1937_p7), [#allocation9], 384  }
 0x5e4   : > { %2098 = vsyncadd (%p1937_p7), [#allocation9], 4294966912 }
 0x5e5 PF: > { %s15_s14 = sadd.s32 1, %s2109_s14   ;;  %s3189_s12 = smov %s2105_s13 }
 0x5e6   : > { %p12_p8 = scmp.ge.s32.totalorder %s15_s14, 102   ;;  %s3190_s13 = smov %s3192_s16 }
 0x5e8   :  { %14 = sbr.rel (!%p12_p8) target bundleno = 2 (0x2), region = 86 }
 0x5ed   :  { %1762 = vsyncpa [#allocation9], 1 }
 0x5ee   :  { %1764 = vsyncpa [#allocation9 + $0x1], 1 }

</bundles_post_ra>
